<compile_context>
chip_gen: v5e
topology: v5e:2x2
jax: 0.10.0
libtpu: 0.0.40
codegen_flags: <defaults>
</compile_context>

<pallas_src>
import functools
import math

import jax
import jax.numpy as jnp
from jax import lax
from jax.experimental import pallas as pl
from jax.experimental.pallas import tpu as pltpu


def _round_up(n: int, m: int) -> int:
    return ((n + m - 1) // m) * m


def _modrelu_kernel(x_ref, b_ref, o_ref):
    x = x_ref[...]                               # (tm, L) interleaved [re, im, ...] f32
    b = b_ref[...]                               # (1, L)  per-pair bias, broadcasts over rows
    L = x.shape[-1]

    sq = x * x
    lane = lax.broadcasted_iota(jnp.int32, x.shape, 1)
    is_re = (lane % 2) == 0                      # even lane -> real half of a pair
    # Partner lane's square via XLU rolls (even lane takes lane+1, odd lane-1).
    # Pairs never straddle a block: L is even and every block spans full rows.
    partner = jnp.where(is_re,
                        pltpu.roll(sq, shift=L - 1, axis=1),   # lane j <- j+1
                        pltpu.roll(sq, shift=1, axis=1))       # lane j <- j-1
    msq = sq + partner                           # |x|^2, same value on both lanes of a pair

    inv = lax.rsqrt(msq)                         # EUP; inf at msq == 0, masked below
    scale = jnp.maximum(1.0 + b * inv, 0.0)      # relu(|x| + b) / |x|
    zero_out = jnp.where(is_re, jnp.maximum(b, 0.0), 0.0)  # |x| == 0: relu(b) + 0j
    # NOTE: denormal |x| (msq underflow) and NaN inputs take the zero branch;
    # guarding them costs extra selects with no wall-clock benefit here.
    o_ref[...] = jnp.where(msq > 0.0, x * scale, zero_out)


def _block_params():
    # <=3 MiB per array block and <=48 MiB scoped VMEM keep 2 streams x 2
    # buffers well inside v7x's 64 MiB VMEM; bump to 4 MiB / 64 MiB on the
    # 128 MiB parts (v5e / v6e) when the chip can be queried.
    block_bytes, vmem_limit = 3 << 20, 48 << 20
    try:
        vmem = getattr(pltpu.get_tpu_info(), "vmem_capacity_bytes", 0)
        if vmem and int(vmem) >= (100 << 20):
            block_bytes, vmem_limit = 4 << 20, 64 << 20
    except Exception:
        pass
    return block_bytes, vmem_limit


def _pick_lane_width(C: int, total: int) -> int:
    # Multiple of lcm(2C, 128) (full vreg lanes + per-pair bias alignment),
    # >= 512 lanes when possible, shrunk back toward the lcm when that makes it
    # divide `total` (so no tail handling is needed at all).
    L0 = (2 * C) * 128 // math.gcd(2 * C, 128)
    L = L0
    while L < 512:
        L *= 2
    while L > L0 and total % L != 0:
        L //= 2
    return L


def _modrelu_tail_jnp(t: jax.Array, b32: jax.Array, C: int) -> jax.Array:
    # Plain-jnp path for the < L-element interleaved tail (a few KiB at most).
    tr, ti = t[0::2], t[1::2]
    n = tr.shape[0]
    bb = jnp.tile(b32, pl.cdiv(n, C))[:n]
    msq = tr * tr + ti * ti
    scale = jnp.maximum(1.0 + bb * lax.rsqrt(msq), 0.0)
    outr = jnp.where(msq > 0.0, tr * scale, jnp.maximum(bb, 0.0))
    outi = jnp.where(msq > 0.0, ti * scale, 0.0)
    return jnp.stack([outr, outi], axis=-1).reshape(-1)


def _modrelu_flat(xf: jax.Array, b32: jax.Array, C: int,
                  block_rows: int | None) -> jax.Array:
    """xf: flat interleaved float32 [r0, i0, r1, i1, ...]; returns same layout."""
    Nf = xf.shape[0]
    L = _pick_lane_width(C, Nf)
    rows = Nf // L
    main = rows * L
    rem = Nf - main

    pieces = []
    if rows > 0:
        # Per-pair bias row: column j holds b[(j // 2) % C].
        b_row = jnp.tile(jnp.repeat(b32, 2), L // (2 * C)).reshape(1, L)

        block_bytes, vmem_limit = _block_params()
        if rows <= 8:
            tm = rows                                        # single full-array block
        else:
            if block_rows is not None:
                tm = max(8, (block_rows // 8) * 8)
            else:
                tm = max(8, (block_bytes // (4 * L)) // 8 * 8)
            # Keep >= 2 grid steps so a v7x megacore shards the parallel axis.
            tm = min(tm, _round_up(pl.cdiv(rows, 2), 8))
            tm = max(8, min(tm, _round_up(rows, 8)))

        # Only the main (rows*L) part goes through the kernel; any remainder is
        # handled below with plain jnp instead of a full-array pad.
        x2d = (xf[:main] if rem else xf).reshape(rows, L)
        row_spec = pl.BlockSpec((tm, L), lambda i: (i, 0))
        out2d = pl.pallas_call(
            _modrelu_kernel,
            out_shape=jax.ShapeDtypeStruct((rows, L), jnp.float32),
            grid_spec=pltpu.PrefetchScalarGridSpec(
                num_scalar_prefetch=0,
                grid=(pl.cdiv(rows, tm),),
                in_specs=[row_spec, pl.BlockSpec((1, L), lambda i: (0, 0))],
                out_specs=row_spec,
            ),
            compiler_params=pltpu.CompilerParams(
                dimension_semantics=("parallel",),
                vmem_limit_bytes=vmem_limit,
            ),
        )(x2d, b_row)
        pieces.append(out2d.reshape(-1))
    if rem > 0:
        pieces.append(_modrelu_tail_jnp(xf[main:], b32, C))
    return pieces[0] if len(pieces) == 1 else jnp.concatenate(pieces)


@functools.partial(jax.jit, static_argnames=("block_rows",))
def modrelu_interleaved(xf: jax.Array, b: jax.Array, *,
                        block_rows: int | None = None) -> jax.Array:
    """Fused fast path: xf is float32 (..., 2C) with interleaved (re, im) pairs."""
    C = b.shape[0]
    assert xf.shape[-1] == 2 * C, "last dim must be 2 * channels (interleaved re/im)"
    out = _modrelu_flat(xf.reshape(-1).astype(jnp.float32),
                        b.astype(jnp.float32), C, block_rows)
    return out.reshape(xf.shape)


@functools.partial(jax.jit, static_argnames=("block_rows",))
def modrelu(x: jax.Array, b: jax.Array, *, block_rows: int | None = None) -> jax.Array:
    """x: complex64 (..., C); b: float32 (C,). Returns complex64."""
    C = x.shape[-1]
    # TODO(synk): lax.bitcast_convert_type rejects complex dtypes, so this
    # interleave and the lax.complex recombine below are each one extra fused
    # HBM pass; callers holding activations as interleaved float32 (..., 2C)
    # should call modrelu_interleaved() directly and skip both.
    xf = jnp.stack([jnp.real(x), jnp.imag(x)], axis=-1)       # (..., C, 2) float32
    yf = _modrelu_flat(xf.reshape(-1), b.astype(jnp.float32), C, block_rows)
    y = yf.reshape(*x.shape, 2)
    return lax.complex(y[..., 0], y[..., 1])


def _modrelu_ref(x, b):
    r = jnp.maximum(jnp.abs(x) + b, 0.0)
    ang = jnp.angle(x)
    return (r * jnp.cos(ang) + 1j * r * jnp.sin(ang)).astype(jnp.complex64)


if __name__ == "__main__":
    key = jax.random.PRNGKey(0)
    k1, k2, k3 = jax.random.split(key, 3)

    B, H, W, C = 2, 32, 32, 8            # channels-last feature map
    xr = jax.random.normal(k1, (B, H, W, C), dtype=jnp.float32)
    xi = jax.random.normal(k2, (B, H, W, C), dtype=jnp.float32)
    x = lax.complex(xr, xi)
    b = 0.02 * jax.random.normal(k3, (C,), dtype=jnp.float32)   # nn.Parameter init

    ref = _modrelu_ref(x, b)

    # complex64 convenience wrapper (auto block size, >=2-step parallel grid)
    out = jax.block_until_ready(modrelu(x, b))
    assert jnp.allclose(out, ref, atol=1e-4, rtol=1e-4), "mismatch (complex wrapper)"

    # fused interleaved-float fast path, forced small blocks -> longer grid
    xf = jnp.stack([xr, xi], axis=-1).reshape(B, H, W, 2 * C)
    ref_f = jnp.stack([jnp.real(ref), jnp.imag(ref)], axis=-1).reshape(B, H, W, 2 * C)
    outf = jax.block_until_ready(modrelu_interleaved(xf, b, block_rows=8))
    assert jnp.allclose(outf, ref_f, atol=1e-4, rtol=1e-4), "mismatch (interleaved path)"

    # ragged shape exercising the small-rows block and the plain-jnp tail path
    xs = x[:, :3, :5, :]
    outs = jax.block_until_ready(modrelu(xs, b))
    assert jnp.allclose(outs, _modrelu_ref(xs, b), atol=1e-4, rtol=1e-4), "mismatch (ragged tail)"

    print("KERNEL_OK")
</pallas_src>

<mosaic_0001>
module attributes {stable_mosaic.version = 11 : i64} {
  func.func @_modrelu_kernel(%arg0: i32, %arg1: memref<32x512xf32, #tpu.memory_space<vmem>>, %arg2: memref<1x512xf32, #tpu.memory_space<vmem>>, %arg3: memref<32x512xf32, #tpu.memory_space<vmem>>) attributes {dimension_semantics = [#tpu.dimension_semantics<parallel>], iteration_bounds = array<i64: 2>, scalar_prefetch = 0 : i64, scratch_operands = 0 : i64, tpu.core_type = #tpu.core_type<tc>, window_params = [{transform_indices = @transform_0, window_bounds = array<i64: 32, 512>}, {pipeline_mode = #tpu.pipeline_mode<synchronous>, transform_indices = @transform_1, window_bounds = array<i64: 1, 512>}, {transform_indices = @transform_2, window_bounds = array<i64: 32, 512>}]} {
    %c0 = arith.constant 0 : index
    %c0_0 = arith.constant 0 : index
    %0 = vector.load %arg1[%c0, %c0_0] : memref<32x512xf32, #tpu.memory_space<vmem>>, vector<32x512xf32>
    %c0_1 = arith.constant 0 : index
    %c0_2 = arith.constant 0 : index
    %1 = vector.load %arg2[%c0_1, %c0_2] : memref<1x512xf32, #tpu.memory_space<vmem>>, vector<1x512xf32>
    %2 = arith.mulf %0, %0 : vector<32x512xf32>
    %3 = tpu.iota {dimensions = array<i32: 1>} : vector<32x512xi32>
    %c2_i32 = arith.constant 2 : i32
    %c0_i32 = arith.constant 0 : i32
    %4 = arith.cmpi eq, %c2_i32, %c0_i32 : i32
    %c1_i32 = arith.constant 1 : i32
    %5 = arith.select %4, %c1_i32, %c2_i32 : i32
    %6 = vector.broadcast %5 : i32 to vector<32x512xi32>
    %7 = arith.remsi %3, %6 : vector<32x512xi32>
    %c0_i32_3 = arith.constant 0 : i32
    %8 = vector.broadcast %c0_i32_3 : i32 to vector<32x512xi32>
    %9 = arith.cmpi ne, %7, %8 : vector<32x512xi32>
    %c0_i32_4 = arith.constant 0 : i32
    %10 = vector.broadcast %c0_i32_4 : i32 to vector<32x512xi32>
    %11 = arith.cmpi slt, %7, %10 : vector<32x512xi32>
    %c0_i32_5 = arith.constant 0 : i32
    %12 = arith.cmpi slt, %5, %c0_i32_5 : i32
    %13 = vector.broadcast %12 : i1 to vector<32x512xi1>
    %14 = vector.broadcast %13 : vector<32x512xi1> to vector<32x512xi1>
    %15 = arith.xori %11, %14 : vector<32x512xi1>
    %16 = arith.andi %15, %9 : vector<32x512xi1>
    %17 = vector.broadcast %5 : i32 to vector<32x512xi32>
    %18 = arith.addi %7, %17 : vector<32x512xi32>
    %19 = arith.select %16, %18, %7 : vector<32x512xi1>, vector<32x512xi32>
    %c0_i32_6 = arith.constant 0 : i32
    %20 = vector.broadcast %c0_i32_6 : i32 to vector<32x512xi32>
    %21 = arith.cmpi eq, %19, %20 : vector<32x512xi32>
    %c511_i32 = arith.constant 511 : i32
    %22 = tpu.dynamic_rotate %2 by %c511_i32 dim 1 : vector<32x512xf32>, i32 -> vector<32x512xf32>
    %c1_i32_7 = arith.constant 1 : i32
    %23 = tpu.dynamic_rotate %2 by %c1_i32_7 dim 1 : vector<32x512xf32>, i32 -> vector<32x512xf32>
    %24 = arith.select %21, %22, %23 : vector<32x512xi1>, vector<32x512xf32>
    %25 = arith.addf %2, %24 : vector<32x512xf32>
    %26 = math.rsqrt %25 : vector<32x512xf32>
    %27 = vector.broadcast %1 : vector<1x512xf32> to vector<32x512xf32>
    %28 = arith.mulf %27, %26 : vector<32x512xf32>
    %cst = arith.constant 1.000000e+00 : f32
    %29 = vector.broadcast %cst : f32 to vector<32x512xf32>
    %30 = arith.addf %29, %28 : vector<32x512xf32>
    %cst_8 = arith.constant 0.000000e+00 : f32
    %31 = vector.broadcast %cst_8 : f32 to vector<32x512xf32>
    %32 = arith.maximumf %30, %31 : vector<32x512xf32>
    %cst_9 = arith.constant 0.000000e+00 : f32
    %33 = vector.broadcast %cst_9 : f32 to vector<1x512xf32>
    %34 = arith.maximumf %1, %33 : vector<1x512xf32>
    %cst_10 = arith.constant 0.000000e+00 : f32
    %35 = vector.shape_cast %34 : vector<1x512xf32> to vector<1x512xf32>
    %36 = vector.broadcast %35 : vector<1x512xf32> to vector<32x512xf32>
    %37 = vector.broadcast %cst_10 : f32 to vector<32x512xf32>
    %38 = arith.select %21, %36, %37 : vector<32x512xi1>, vector<32x512xf32>
    %cst_11 = arith.constant 0.000000e+00 : f32
    %39 = vector.broadcast %cst_11 : f32 to vector<32x512xf32>
    %40 = arith.cmpf ogt, %25, %39 : vector<32x512xf32>
    %41 = arith.mulf %0, %32 : vector<32x512xf32>
    %42 = arith.select %40, %41, %38 : vector<32x512xi1>, vector<32x512xf32>
    %c0_12 = arith.constant 0 : index
    %c0_13 = arith.constant 0 : index
    %43 = vector.load %arg3[%c0_12, %c0_13] : memref<32x512xf32, #tpu.memory_space<vmem>>, vector<32x512xf32>
    tpu.vector_store %arg3[%c0_12, %c0_13], %42 {strides = array<i32>} : memref<32x512xf32, #tpu.memory_space<vmem>>, vector<32x512xf32>,
    return
  }
  func.func @transform_0(%arg0: i32) -> (i32, i32) {
    %c0_i32 = arith.constant 0 : i32
    %c0_i32_0 = arith.constant 0 : i32
    return %arg0, %c0_i32 : i32, i32
  }
  func.func @transform_1(%arg0: i32) -> (i32, i32) {
    %c0_i32 = arith.constant 0 : i32
    %c0_i32_0 = arith.constant 0 : i32
    %c0_i32_1 = arith.constant 0 : i32
    return %c0_i32, %c0_i32_0 : i32, i32
  }
  func.func @transform_2(%arg0: i32) -> (i32, i32) {
    %c0_i32 = arith.constant 0 : i32
    %c0_i32_0 = arith.constant 0 : i32
    return %arg0, %c0_i32 : i32, i32
  }
}

</mosaic_0001>

<bundles_post_ra>
// kernel: custom-call
= control target key start
LH: loop header
LB: loop body
LE: loop exit
PB: predicated region body
PF: predicated region fallthrough
CT: control target
= control target key end

     0   :  { %2 = vsyncpa [#allocation0], 0  ;;  %s55_s0 = inlined_call_operand.hbm [shape: c64[2,32,32,8], index: 0, kind: input, shape index: {}]   ;;  %s56_s1 = inlined_call_operand.vmem [shape: f32[2,32,32,8], index: 1, kind: output, shape index: {}]  }
   0x1   :  { %s4_s8 = sshll.u32 %s55_s0, 4  ;;  %s6_s11 = sshll.u32 %s56_s1, 4  ;;  %s5_s8 = int_to_ptr.hbm [resolvable:$true] %s4_s8  ;;  %s7_s11 = int_to_ptr.vmem [resolvable:$true] %s6_s11 }
   0x2   :  { %9 = dma.hbm_to_vmem [thread:$0]  %s5_s8, 8192, %s7_s11, [#allocation0] }
   0x3   :  { %37 = dma.done.wait [#allocation0], 8192  }
   0x4   :  { %38 = vsyncadd [#allocation0], 4294959104 }
   0x5   :  { %12 = vsyncpa [#allocation0], 1 }

// kernel: custom-call.1
= control target key start
LH: loop header
LB: loop body
LE: loop exit
PB: predicated region body
PF: predicated region fallthrough
CT: control target
= control target key end

     0   :  { %s56_s0 = inlined_call_operand.hbm [shape: c64[2,32,32,8], index: 0, kind: input, shape index: {}]   ;;  %s57_s1 = inlined_call_operand.vmem [shape: f32[2,32,32,8], index: 1, kind: output, shape index: {}]  }
   0x1   :  { %s2_s8 = scalar_lea.hbm %s56_s0, 512 }
   0x2   :  { %3 = vsyncpa [#allocation0], 0  ;;  %s5_s9 = sshll.u32 %s2_s8, 4  ;;  %s7_s12 = sshll.u32 %s57_s1, 4  ;;  %s6_s9 = int_to_ptr.hbm [resolvable:$true] %s5_s9  ;;  %s8_s12 = int_to_ptr.vmem [resolvable:$true] %s7_s12 }
   0x3   :  { %10 = dma.hbm_to_vmem [thread:$0]  %s6_s9, 8192, %s8_s12, [#allocation0] }
   0x4   :  { %38 = dma.done.wait [#allocation0], 8192  }
   0x5   :  { %39 = vsyncadd [#allocation0], 4294959104 }
   0x6   :  { %13 = vsyncpa [#allocation0], 1 }

// kernel: tile.5
= control target key start
LH: loop header
LB: loop body
LE: loop exit
PB: predicated region body
PF: predicated region fallthrough
CT: control target
= control target key end

     0   :  { %s67_s10 = smov 14   ;;  %s68_s11 = smov 10   ;;  %vm3_vm0 = vcmask 15360   ;;  %vm9_vm1 = vcmask 130160   ;;  %vm15_vm2 = vcmask 113760   ;;  %vm21_vm3 = vcmask 97360   ;;  %s111_s0 = inlined_call_operand.vmem [shape: f32[8,2], index: 0, kind: input, shape index: {}]   ;;  %s112_s1 = inlined_call_operand.vmem [shape: f32[16], index: 1, kind: output, shape index: {}]  }
   0x1   :  { %v53_v0 = vld [vmem:[%s111_s0 + $0x7] sm:$0x1]   ;;  %v55_v1 = vld [vmem:[%s111_s0 + $0x5] sm:$0x1]   ;;  %v57_v2 = vld [vmem:[%s111_s0 + $0x3] sm:$0x1]  }
   0x2   :  { %7 = vrot.lane.b32.xlu0 %v53_v0, %s67_s10  ;;  %19 = vrot.lane.b32.xlu1 %v55_v1, %s68_s11  ;;  %s69_s14 = smov 6   ;;  %v54_v3 = vld [vmem:[%s111_s0 + $0x6] sm:$0x1]   ;;  %v56_v4 = vld [vmem:[%s111_s0 + $0x4] sm:$0x1]   ;;  %s70_s21 = smov 12  }
   0x3   :  { %31 = vrot.lane.b32.xlu2 %v57_v2, %s69_s14  ;;  %v58_v5 = vld [vmem:[%s111_s0 + $0x2] sm:$0x1]   ;;  %s71_s22 = smov 8   ;;  %s72_s23 = smov 4   ;;  %v59_v6 = vld [vmem:[%s111_s0 + $0x1] sm:$0x1]  }
   0x4   :  { %s73_s26 = smov 2   ;;  %v2_v7 = vld [vmem:[%s111_s0] sm:$0x1]   ;;  %vm27_vm4 = vcmask 80960   ;;  %vm33_vm5 = vcmask 64560   ;;  %vm39_vm6 = vcmask 48160  }
   0x5   :  { %4 = vst.msk [vmem:[#allocation0] sm:$0x1] %vm3_vm0, %v2_v7   ;;  %vm45_vm7 = vcmask 31760  }
   0xa   :  { %13 = vrot.lane.b32.xlu0 %v54_v3, %s70_s21  ;;  %25 = vrot.lane.b32.xlu1 %v56_v4, %s71_s22 }
   0xb   :  { %37 = vrot.lane.b32.xlu2 %v58_v5, %s72_s23 }
  0x12   :  { %43 = vrot.lane.b32.xlu0 %v59_v6, %s73_s26 }
  0x5d   :  { %v32_v8 = vpop.permute.xlu2 %31  }
  0x65   :  { %v38_v9 = vpop.permute.xlu2 %37  }
  0x74   :  { %v8_v10 = vpop.permute.xlu0 %7   ;;  %v20_v11 = vpop.permute.xlu1 %19  }
  0x75   :  { %10 = vst.msk [vmem:[#allocation0] sm:$0x1] %vm9_vm1, %v8_v10  }
  0x7c   :  { %v14_v12 = vpop.permute.xlu0 %13   ;;  %v26_v13 = vpop.permute.xlu1 %25  }
  0x7d   :  { %16 = vst.msk [vmem:[#allocation0] sm:$0x1] %vm15_vm2, %v14_v12  }
  0x7e   :  { %22 = vst.msk [vmem:[#allocation0] sm:$0x1] %vm21_vm3, %v20_v11  }
  0x7f   :  { %28 = vst.msk [vmem:[#allocation0] sm:$0x1] %vm27_vm4, %v26_v13  }
  0x80   :  { %34 = vst.msk [vmem:[#allocation0] sm:$0x1] %vm33_vm5, %v32_v8  }
  0x81   :  { %40 = vst.msk [vmem:[#allocation0] sm:$0x1] %vm39_vm6, %v38_v9  }
  0x84   :  { %v44_v14 = vpop.permute.xlu0 %43  }
  0x85   :  { %46 = vst.msk [vmem:[#allocation0] sm:$0x1] %vm45_vm7, %v44_v14  }
  0x8c   :  { %v49_v15 = vld [vmem:[#allocation0] sm:$0x1] }
  0x8d   :  { %52 = vst [vmem:[%s112_s1] sm:$0x1] %v49_v15 }

// kernel: tile.6
= control target key start
LH: loop header
LB: loop body
LE: loop exit
PB: predicated region body
PF: predicated region fallthrough
CT: control target
= control target key end

     0   :  { %s40_s0 = inlined_call_operand.vmem [shape: f32[16], index: 0, kind: input, shape index: {}]   ;;  %s41_s1 = inlined_call_operand.vmem [shape: f32[32,16], index: 1, kind: output, shape index: {}]  }
   0x1   :  { %v4_v0 = vld [vmem:[%s40_s0] ss:$0 sm:$0xff] }
   0x2   :  { %5 = vst [vmem:[%s41_s1] sm:$0xff] %v4_v0 }
   0x3   :  { %12 = vst [vmem:[%s41_s1 + $0x8] sm:$0xff] %v4_v0 }
   0x4   :  { %13 = vst [vmem:[%s41_s1 + $0x10] sm:$0xff] %v4_v0 }
   0x5   :  { %14 = vst [vmem:[%s41_s1 + $0x18] sm:$0xff] %v4_v0 }

// kernel: tile.7
= control target key start
LH: loop header
LB: loop body
LE: loop exit
PB: predicated region body
PF: predicated region fallthrough
CT: control target
= control target key end

     0   :  { %s88_s8 = smov 112   ;;  %s89_s11 = smov 80   ;;  %vm3_vm0 = vcmask 130048   ;;  %vm9_vm1 = vcmask 1048448   ;;  %vm15_vm2 = vcmask 917248   ;;  %vm21_vm3 = vcmask 786048   ;;  %s141_s0 = inlined_call_operand.vmem [shape: f32[32,16], index: 0, kind: input, shape index: {}]   ;;  %s142_s1 = inlined_call_operand.vmem [shape: f32[1,512], index: 1, kind: output, shape index: {}]  }
   0x1   :  { %v71_v0 = vld [vmem:[%s141_s0 + $0x7] ss:$8 sm:$0xf]   ;;  %v73_v1 = vld [vmem:[%s141_s0 + $0x5] ss:$8 sm:$0xf]  }
   0x2   :  { %7 = vrot.lane.b32.xlu0 %v71_v0, %s88_s8  ;;  %19 = vrot.lane.b32.xlu1 %v73_v1, %s89_s11  ;;  %v75_v2 = vld [vmem:[%s141_s0 + $0x3] ss:$8 sm:$0xf]   ;;  %s90_s14 = smov 48   ;;  %s91_s19 = smov 96   ;;  %vm27_vm4 = vcmask 654848  }
   0x3   :  { %31 = vrot.lane.b32.xlu2 %v75_v2, %s90_s14  ;;  %v72_v3 = vld [vmem:[%s141_s0 + $0x6] ss:$8 sm:$0xf]   ;;  %v74_v4 = vld [vmem:[%s141_s0 + $0x4] ss:$8 sm:$0xf]  }
   0x4   :  { %s92_s20 = smov 64   ;;  %v76_v5 = vld [vmem:[%s141_s0 + $0x2] ss:$8 sm:$0xf]   ;;  %s93_s23 = smov 32   ;;  %vm33_vm5 = vcmask 523648  }
   0x5   :  { %v77_v6 = vld [vmem:[%s141_s0 + $0x1] ss:$8 sm:$0xf]   ;;  %s94_s26 = smov 16   ;;  %vm39_vm6 = vcmask 392448   ;;  %vm45_vm7 = vcmask 261248  }
   0x6   :  { %v2_v7 = vld [vmem:[%s141_s0] ss:$8 sm:$0xf]  }
   0x7   :  { %4 = vst.msk [vmem:[#allocation0] ss:$8 sm:$0xf] %vm3_vm0, %v2_v7  }
   0xa   :  { %13 = vrot.lane.b32.xlu0 %v72_v3, %s91_s19  ;;  %25 = vrot.lane.b32.xlu1 %v74_v4, %s92_s20 }
   0xb   :  { %37 = vrot.lane.b32.xlu2 %v76_v5, %s93_s23 }
  0x12   :  { %43 = vrot.lane.b32.xlu0 %v77_v6, %s94_s26 }
  0x5d   :  { %v32_v8 = vpop.permute.xlu2 %31  }
  0x65   :  { %v38_v9 = vpop.permute.xlu2 %37  }
  0x74   :  { %v8_v10 = vpop.permute.xlu0 %7   ;;  %v20_v11 = vpop.permute.xlu1 %19  }
  0x75   :  { %10 = vst.msk [vmem:[#allocation0] ss:$8 sm:$0xf] %vm9_vm1, %v8_v10  }
  0x7c   :  { %v14_v12 = vpop.permute.xlu0 %13   ;;  %v26_v13 = vpop.permute.xlu1 %25  }
  0x7d   :  { %16 = vst.msk [vmem:[#allocation0] ss:$8 sm:$0xf] %vm15_vm2, %v14_v12  }
  0x7e   :  { %22 = vst.msk [vmem:[#allocation0] ss:$8 sm:$0xf] %vm21_vm3, %v20_v11  }
  0x7f   :  { %28 = vst.msk [vmem:[#allocation0] ss:$8 sm:$0xf] %vm27_vm4, %v26_v13  }
  0x80   :  { %34 = vst.msk [vmem:[#allocation0] ss:$8 sm:$0xf] %vm33_vm5, %v32_v8  }
  0x81   :  { %40 = vst.msk [vmem:[#allocation0] ss:$8 sm:$0xf] %vm39_vm6, %v38_v9  }
  0x84   :  { %v44_v14 = vpop.permute.xlu0 %43  }
  0x85   :  { %46 = vst.msk [vmem:[#allocation0] ss:$8 sm:$0xf] %vm45_vm7, %v44_v14  }
  0x8c   :  { %v49_v15 = vld [vmem:[#allocation0] sm:$0x1]  ;;  %v54_v16 = vld [vmem:[#allocation0 + $0x8] sm:$0x1]  ;;  %v60_v17 = vld [vmem:[#allocation0 + $0x10] sm:$0x1] }
  0x8d   :  { %52 = vst [vmem:[%s142_s1] sm:$0x1] %v49_v15  ;;  %v66_v18 = vld [vmem:[#allocation0 + $0x18] sm:$0x1] }
  0x8e   :  { %78 = vst [vmem:[%s142_s1 + $0x1] sm:$0x1] %v54_v16 }
  0x8f   :  { %79 = vst [vmem:[%s142_s1 + $0x2] sm:$0x1] %v60_v17 }
  0x90   :  { %80 = vst [vmem:[%s142_s1 + $0x3] sm:$0x1] %v66_v18 }

// kernel: modrelu.1
= control target key start
LH: loop header
LB: loop body
LE: loop exit
PB: predicated region body
PF: predicated region fallthrough
CT: control target
= control target key end

     0   :  { %s807_s9 = smov 0   ;;  %s1496_s0 = inlined_call_operand.vmem [shape: f32[64,512], index: 0, kind: input, shape index: {}]   ;;  %s1497_s1 = inlined_call_operand.vmem [shape: f32[1,512], index: 1, kind: input, shape index: {}]   ;;  %s1498_s2 = inlined_call_operand.vmem [shape: f32[64,512], index: 2, kind: output, shape index: {}]  }
   0x1 LB: > { %s725_s10 = sadd.s32 4294967295, %s788_s9   ;;  %p729_p0 = scmp.ge.s32.totalorder %s788_s9, 1  ;;  %s788_s9 = sphi %s807_s9, %s12_s9  }
   0x2   : > { %p114_p1 = scmp.lt.s32.totalorder %s788_s9, 3 }
   0x4   : > { %p115_p2 = pnand %p729_p0, %p114_p1 }
   0x6   : > { %118 = sbr.rel (%p115_p2) target bundleno = 258 (0x102), region = 28 }
   0xb   : > { %s730_s11 = sshll.u32 %s725_s10, 2  ;;  %s790_s16 = smov 127   ;;  %v185_v38 = vlaneseq  ;;  %v168_v60 = vld [vmem:[%s1497_s1] sm:$0xf] }
   0xc   : > { %p139_p3 = scmp.lt.s32.totalorder %s730_s11, 7  ;;  %s791_s17 = smov 1   ;;  %v1044_v62 = vmax.f32 %v168_v60, 0.0 }
   0xd   : > { %v1007_v41 = vand.u32 127, %v185_v38 }
   0xe   : > { %s1547_s11 = smov (!%p139_p3, %s730_s11), 7 }
   0xf   : > { %s738_s12 = sshll.u32 %s1547_s11, 5  ;;  %v187_v42 = vadd.s32 128, %v1007_v41  ;;  %vm323_vm0 = vcmp.lt.s32.totalorder %v1007_v41, 1  ;;  %vm274_vm2 = vcmp.lt.s32.totalorder %v1007_v41, 127  ;;  %v188_v49 = vadd.s32 256, %v1007_v41 }
  0x10   : > { %s823_s15 = scalar_lea.vmem %s1496_s0, %s738_s12  ;;  %v189_v50 = vadd.s32 384, %v1007_v41  ;;  %v194_v56 = vand.u32 1, %v1007_v41  ;;  %s1190_s22 = scalar_lea.vmem %s1498_s2, %s738_s12 }
  0x11   : > { %v826_v0 = vld [vmem:[%s823_s15 + $0x40] sm:$0xff]  ;;  %v829_v1 = vld [vmem:[%s823_s15 + $0x8] sm:$0xff]  ;;  %v883_v13 = vld [vmem:[%s823_s15 + $0x10] sm:$0xff]  ;;  %v201_v45 = vand.u32 1, %v187_v42  ;;  %v208_v57 = vand.u32 1, %v188_v49 }
  0x12   : > { %1511 = vst [vmem:[#allocation2_spill] sm:$0xff] %v826_v0  ;;  %v832_v2 = vld [vmem:[%s823_s15] sm:$0xff]  ;;  %v836_v3 = vmul.f32 %v826_v0, %v826_v0  ;;  %v840_v4 = vmul.f32 %v829_v1, %v829_v1  ;;  %v856_v7 = vld [vmem:[%s823_s15 + $0x28] sm:$0xff]  ;;  %v894_v16 = vmul.f32 %v883_v13, %v883_v13  ;;  %v907_v18 = vld [vmem:[%s823_s15 + $0x18] sm:$0xff]  ;;  %v215_v58 = vand.u32 1, %v189_v50 }
  0x13   : > { %v844_v5 = vmul.f32 %v832_v2, %v832_v2  ;;  %v853_v6 = vld [vmem:[%s823_s15 + $0x60] sm:$0xff]  ;;  %v867_v10 = vmul.f32 %v856_v7, %v856_v7  ;;  %v880_v12 = vld [vmem:[%s823_s15 + $0x68] sm:$0xff]  ;;  %v911_v19 = vmul.f32 %v907_v18, %v907_v18  ;;  %v920_v20 = vld [vmem:[%s823_s15 + $0x30] sm:$0xff]  ;;  %vm1017_vm1 = vcmp.eq.s32.totalorder %v201_v45, 0 }
  0x14   : > { %246 = vrot.lane.b32.xlu1 %v836_v3, %s790_s16  ;;  %250 = vrot.lane.b32.xlu2 %v840_v4, %s790_s16  ;;  %1512 = vst [vmem:[#allocation3_spill] sm:$0xff] %v853_v6  ;;  %v859_v8 = vld [vmem:[%s823_s15 + $0x20] sm:$0xff]  ;;  %v863_v9 = vmul.f32 %v853_v6, %v853_v6  ;;  %v886_v14 = vld [vmem:[%s823_s15 + $0x48] sm:$0xff]  ;;  %v890_v15 = vmul.f32 %v880_v12, %v880_v12  ;;  %vm1040_vm3 = vcmp.eq.s32.totalorder %v194_v56, 0  ;;  %vm1046_vm4 = vcmp.eq.s32.totalorder %v208_v57, 0 }
  0x15   : > { %242 = vrot.lane.b32.xlu0 %v844_v5, %s790_s16  ;;  %v871_v11 = vmul.f32 %v859_v8, %v859_v8  ;;  %1514 = vst [vmem:[#allocation5_spill] sm:$0xff] %v880_v12  ;;  %v898_v17 = vmul.f32 %v886_v14, %v886_v14  ;;  %v924_v21 = vmul.f32 %v920_v20, %v920_v20  ;;  %v933_v22 = vld [vmem:[%s823_s15 + $0x38] sm:$0xff]  ;;  %v946_v24 = vld [vmem:[%s823_s15 + $0x50] sm:$0xff]  ;;  %vm1050_vm5 = vcmp.eq.s32.totalorder %v215_v58, 0 }
  0x16   : > { %1513 = vst [vmem:[#allocation4_spill] sm:$0xff] %v863_v9  ;;  %v937_v23 = vmul.f32 %v933_v22, %v933_v22  ;;  %v950_v25 = vmul.f32 %v946_v24, %v946_v24  ;;  %v959_v26 = vld [vmem:[%s823_s15 + $0x58] sm:$0xff]  ;;  %v972_v28 = vld [vmem:[%s823_s15 + $0x70] sm:$0xff] }
  0x17   : > { %1515 = vst [vmem:[#allocation6_spill] sm:$0xff] %v886_v14  ;;  %v963_v27 = vmul.f32 %v959_v26, %v959_v26  ;;  %v976_v29 = vmul.f32 %v972_v28, %v972_v28  ;;  %v985_v30 = vld [vmem:[%s823_s15 + $0x78] sm:$0xff] }
  0x18   : > { %1516 = vst [vmem:[#allocation7_spill] sm:$0xff] %v946_v24  ;;  %v989_v31 = vmul.f32 %v985_v30, %v985_v30 }
  0x19   : > { %1517 = vst [vmem:[#allocation8_spill] sm:$0xff] %v959_v26 }
  0x1a   : > { %1518 = vst [vmem:[#allocation9_spill] sm:$0xff] %v972_v28  ;;  %v1125_v28 = vperm.slane %v168_v60, 3 }
  0x1b   : > { %1519 = vst [vmem:[#allocation10_spill] sm:$0xff] %v976_v29 }
  0x1c   : > { %248 = vrot.lane.b32.xlu1 %v863_v9, %s790_s16  ;;  %252 = vrot.lane.b32.xlu2 %v867_v10, %s790_s16  ;;  %1520 = vst [vmem:[#allocation11_spill] sm:$0xff] %v985_v30  ;;  %v1123_v30 = vperm.slane %v168_v60, 2 }
  0x1d   : > { %244 = vrot.lane.b32.xlu0 %v871_v11, %s790_s16  ;;  %1521 = vst [vmem:[#allocation12_spill] sm:$0xff] %v989_v31 }
  0x24   : > { %256 = vrot.lane.b32.xlu1 %v890_v15, %s790_s16  ;;  %258 = vrot.lane.b32.xlu2 %v894_v16, %s790_s16 }
  0x25   : > { %254 = vrot.lane.b32.xlu0 %v898_v17, %s790_s16 }
  0x2c   : > { %299 = vrot.lane.b32.xlu2 %v840_v4, %s791_s17  ;;  %291 = vrot.lane.b32.xlu1 %v844_v5, %s791_s17 }
  0x2d   : > { %266 = vrot.lane.b32.xlu0 %v911_v19, %s790_s16 }
  0x34   : > { %260 = vrot.lane.b32.xlu2 %v924_v21, %s790_s16  ;;  %315 = vrot.lane.b32.xlu1 %v911_v19, %s791_s17 }
  0x35   : > { %307 = vrot.lane.b32.xlu0 %v894_v16, %s791_s17 }
  0x3c   : > { %301 = vrot.lane.b32.xlu2 %v867_v10, %s791_s17  ;;  %293 = vrot.lane.b32.xlu1 %v871_v11, %s791_s17 }
  0x3d   : > { %268 = vrot.lane.b32.xlu0 %v937_v23, %s790_s16 }
  0x44   : > { %262 = vrot.lane.b32.xlu2 %v950_v25, %s790_s16  ;;  %317 = vrot.lane.b32.xlu1 %v937_v23, %s791_s17 }
  0x45   : > { %309 = vrot.lane.b32.xlu0 %v924_v21, %s791_s17 }
  0x4c   : > { %303 = vrot.lane.b32.xlu2 %v898_v17, %s791_s17  ;;  %295 = vrot.lane.b32.xlu1 %v836_v3, %s791_s17 }
  0x4d   : > { %270 = vrot.lane.b32.xlu0 %v963_v27, %s790_s16 }
  0x54   : > { %264 = vrot.lane.b32.xlu2 %v976_v29, %s790_s16  ;;  %319 = vrot.lane.b32.xlu1 %v963_v27, %s791_s17 }
  0x55   : > { %311 = vrot.lane.b32.xlu0 %v950_v25, %s791_s17 }
  0x5c   : > { %297 = vrot.lane.b32.xlu1 %v863_v9, %s791_s17  ;;  %305 = vrot.lane.b32.xlu2 %v890_v15, %s791_s17 }
  0x5d   : > { %272 = vrot.lane.b32.xlu0 %v989_v31, %s790_s16 }
  0x64   : > { %321 = vrot.lane.b32.xlu1 %v989_v31, %s791_s17 }
  0x65   : > { %313 = vrot.lane.b32.xlu0 %v976_v29, %s791_s17 }
  0x6e   : > { %v251_v32 = vpop.permute.xlu2 %250 }
  0x76   : > { %v253_v33 = vpop.permute.xlu2 %252 }
  0x7e   : > { %v259_v35 = vpop.permute.xlu2 %258 }
  0x7f   : > { %v279_v51 = vsel %vm274_vm2, %v251_v32, %v259_v35 }
  0x86   : > { %v1001_v34 = vpop.permute.xlu1 %246  ;;  %v300_v40 = vpop.permute.xlu2 %299 }
  0x87   : > { %v243_v36 = vpop.permute.xlu0 %242 }
  0x88   : > { %v283_v42 = vsel %vm274_vm2, %v243_v36, %v251_v32 }
  0x8e   : > { %v1003_v37 = vpop.permute.xlu1 %248  ;;  %v1014_v46 = vpop.permute.xlu2 %260 }
  0x8f   : > { %1522 = vst [vmem:[#allocation13_spill] sm:$0xff] %v1003_v37  ;;  %v1005_v39 = vpop.permute.xlu0 %244 }
  0x96   : > { %v1010_v43 = vpop.permute.xlu1 %256  ;;  %v1035_v59 = vpop.permute.xlu2 %301 }
  0x97   : > { %v1012_v44 = vpop.permute.xlu0 %254 }
  0x9e   : > { %v292_v48 = vpop.permute.xlu1 %291 }
  0x9f   : > { %v332_v52 = vsel %vm323_vm0, %v292_v48, %v300_v40  ;;  %v267_v53 = vpop.permute.xlu0 %266 }
  0xa0   : > { %v341_v54 = vsel %vm1017_vm1, %v279_v51, %v332_v52  ;;  %v275_v45 = vsel %vm274_vm2, %v259_v35, %v267_v53  ;;  %v287_v51 = vsel %vm274_vm2, %v267_v53, %v243_v36  ;;  %v592_v36 = vperm.slane %v1044_v62, 1 }
  0xa1   : > { %v1031_v55 = vadd.f32 %v341_v54, %v840_v4 }
  0xa3   : > { %750 = vrsqrt.f32 %v1031_v55  ;;  %vm388_vm7 = vweird.f32 %v1031_v55  ;;  %vm604_vm9 = vcmp.gt.f32.partialorder %v1031_v55, 0.0 }
  0xa6   : > { %v316_v63 = vpop.permute.xlu1 %315 }
  0xa7   : > { %v336_v49 = vsel %vm323_vm0, %v316_v63, %v292_v48  ;;  %v308_v50 = vpop.permute.xlu0 %307 }
  0xa8   : > { %v340_v52 = vsel %vm1040_vm3, %v283_v42, %v336_v49  ;;  %v324_v54 = vsel %vm323_vm0, %v308_v50, %v316_v63  ;;  %v328_v56 = vsel %vm323_vm0, %v300_v40, %v308_v50  ;;  %v1085_v40 = vperm.slane %v168_v60, 1 }
  0xa9   : > { %v751_v32 = vpop.eup %750  ;;  %v1069_v57 = vadd.f32 %v340_v52, %v844_v5  ;;  %v342_v35 = vsel %vm1046_vm4, %v275_v45, %v328_v56  ;;  %v343_v48 = vsel %vm1050_vm5, %v287_v51, %v324_v54  ;;  %v280_v42 = vsel %vm274_vm2, %v253_v33, %v1014_v46  ;;  %v1110_v52 = vpop.permute.xlu2 %262 }
  0xaa   : > { %v383_v53 = vmul.f32 %v751_v32, %v1031_v55  ;;  %v1078_v58 = vadd.f32 %v342_v35, %v894_v16  ;;  %v1081_v63 = vadd.f32 %v343_v48, %v911_v19  ;;  %v284_v16 = vsel %vm274_vm2, %v1005_v39, %v253_v33 }
  0xab   : > { %752 = vrsqrt.f32 %v1069_v57  ;;  %v1096_v19 = vsel %vm1017_vm1, %v592_v36, 0.0  ;;  %v1102_v50 = vsel %vm274_vm2, %v1003_v37, %v1010_v43  ;;  %v1108_v51 = vsel %vm274_vm2, %v1001_v34, %v1012_v44 }
  0xac   : > { %v384_v5 = vmul.f32 %v751_v32, %v383_v53  ;;  %754 = vrsqrt.f32 %v1078_v58  ;;  %1531 = vst [vmem:[#allocation14_spill] sm:$0xff] %v1102_v50  ;;  %v591_v33 = vperm.slane %v1044_v62, 0  ;;  %vm389_vm6 = vweird.f32 %v751_v32 }
  0xad   : > { %756 = vrsqrt.f32 %v1081_v63  ;;  %v593_v48 = vperm.slane %v1044_v62, 2  ;;  %vm390_vm8 = vmor %vm388_vm7, %vm389_vm6  ;;  %vm378_vm10 = vweird.f32 %v1069_v57  ;;  %vm398_vm11 = vweird.f32 %v1078_v58 }
  0xae   : > { %v385_v45 = vmul.f32 0.5, %v384_v5  ;;  %v294_v49 = vpop.permute.xlu1 %293  ;;  %v1121_v5 = vperm.slane %v168_v60, 0  ;;  %vm408_vm12 = vweird.f32 %v1081_v63 }
  0xaf   : > { %v333_v54 = vsel %vm323_vm0, %v294_v49, %v1035_v59  ;;  %v1116_v56 = vpop.permute.xlu0 %268  ;;  %v1153_v24 = vsel %vm1046_vm4, %v593_v48, 0.0 }
  0xb0   : > { %v386_v35 = vsub.f32 1.5, %v385_v45  ;;  %v345_v36 = vsel %vm1017_vm1, %v280_v42, %v333_v54  ;;  %v1136_v45 = vsel %vm274_vm2, %v1012_v44, %v1110_v52 }
  0xb1   : > { %v753_v53 = vpop.eup %752  ;;  %v1128_v6 = vadd.f32 %v345_v36, %v867_v10  ;;  %v1144_v10 = vsel %vm1040_vm3, %v591_v33, 0.0 }
  0xb2   : > { %v1130_v12 = vpop.eup %754  ;;  %v387_v26 = vmul.f32 %v751_v32, %v386_v35  ;;  %v373_v42 = vmul.f32 %v753_v53, %v1069_v57  ;;  %vm379_vm13 = vweird.f32 %v753_v53 }
  0xb3   : > { %v1140_v54 = vpop.eup %756  ;;  %v393_v36 = vmul.f32 %v1130_v12, %v1078_v58  ;;  %758 = vrsqrt.f32 %v1128_v6  ;;  %vm399_vm14 = vweird.f32 %v1130_v12  ;;  %vm380_vm6 = vmor %vm378_vm10, %vm379_vm13  ;;  %vm603_vm10 = vcmp.gt.f32.partialorder %v1069_v57, 0.0 }
  0xb4   : > { %v391_v44 = vsel %vm390_vm8, %v751_v32, %v387_v26  ;;  %v374_v35 = vmul.f32 %v753_v53, %v373_v42  ;;  %v403_v0 = vmul.f32 %v1140_v54, %v1081_v63  ;;  %v276_v32 = vsel %vm274_vm2, %v1014_v46, %v1116_v56  ;;  %v1174_v46 = vpop.permute.xlu2 %303  ;;  %vm400_vm7 = vmor %vm398_vm11, %vm399_vm14 }
  0xb5   : > { %v542_v33 = vmul.f32 %v1085_v40, %v391_v44  ;;  %v394_v60 = vmul.f32 %v1130_v12, %v393_v36  ;;  %vm409_vm15 = vweird.f32 %v1140_v54  ;;  %vm428_vm11 = vweird.f32 %v1128_v6 }
  0xb6   : > { %v375_v31 = vmul.f32 0.5, %v374_v35  ;;  %v404_v26 = vmul.f32 %v1140_v54, %v403_v0  ;;  %v318_v48 = vpop.permute.xlu1 %317  ;;  %vm410_vm8 = vmor %vm408_vm12, %vm409_vm15  ;;  %vm605_vm13 = vcmp.gt.f32.partialorder %v1078_v58, 0.0  ;;  %vm606_vm14 = vcmp.gt.f32.partialorder %v1081_v63, 0.0 }
  0xb7   : > { %v558_v42 = vadd.f32 1.0, %v542_v33  ;;  %v395_v44 = vmul.f32 0.5, %v394_v60  ;;  %v337_v29 = vsel %vm323_vm0, %v318_v48, %v294_v49  ;;  %v310_v36 = vpop.permute.xlu0 %309 }
  0xb8   : > { %v376_v14 = vsub.f32 1.5, %v375_v31  ;;  %v405_v0 = vmul.f32 0.5, %v404_v26  ;;  %v344_v35 = vsel %vm1040_vm3, %v284_v16, %v337_v29  ;;  %v329_v29 = vsel %vm323_vm0, %v1035_v59, %v310_v36 }
  0xb9   : > { %v1172_v37 = vpop.eup %758  ;;  %v574_v9 = vmax.f32 %v558_v42, 0.0  ;;  %v396_v33 = vsub.f32 1.5, %v395_v44  ;;  %v1178_v60 = vadd.f32 %v344_v35, %v871_v11 }
  0xba   : > { %v377_v49 = vmul.f32 %v753_v53, %v376_v14  ;;  %v406_v50 = vsub.f32 1.5, %v405_v0  ;;  %v423_v31 = vmul.f32 %v1172_v37, %v1128_v6  ;;  %v325_v14 = vsel %vm323_vm0, %v310_v36, %v318_v48 }
  0xbb   : > { %v620_v16 = vmul.f32 %v574_v9, %v829_v1  ;;  %v397_v11 = vmul.f32 %v1130_v12, %v396_v33  ;;  %760 = vrsqrt.f32 %v1178_v60  ;;  %v288_v9 = vsel %vm274_vm2, %v1116_v56, %v1005_v39 }
  0xbc   : > { %v381_v59 = vsel %vm380_vm6, %v753_v53, %v377_v49  ;;  %v407_v26 = vmul.f32 %v1140_v54, %v406_v50  ;;  %v424_v1 = vmul.f32 %v1172_v37, %v423_v31  ;;  %v346_v50 = vsel %vm1046_vm4, %v276_v32, %v329_v29 }
  0xbd   : > { %v636_v42 = vsel %vm604_vm9, %v620_v16, %v1096_v19  ;;  %v541_v53 = vmul.f32 %v1121_v5, %v381_v59  ;;  %v401_v48 = vsel %vm400_vm7, %v1130_v12, %v397_v11  ;;  %v347_v55 = vsel %vm1050_vm5, %v288_v9, %v325_v14 }
  0xbe   : > { %652 = vst [vmem:[%s1190_s22 + $0x8] sm:$0xff] %v636_v42  ;;  %v411_v44 = vsel %vm410_vm8, %v1140_v54, %v407_v26  ;;  %v543_v39 = vmul.f32 %v1123_v30, %v401_v48  ;;  %v425_v56 = vmul.f32 0.5, %v424_v1  ;;  %v296_v36 = vpop.permute.xlu1 %295  ;;  %v1228_v35 = vadd.f32 %v346_v50, %v924_v21  ;;  %v1248_v1 = vpop.permute.xlu2 %264 }
  0xbf   : > { %v557_v0 = vadd.f32 1.0, %v541_v53  ;;  %v544_v12 = vmul.f32 %v1125_v28, %v411_v44  ;;  %v1231_v33 = vadd.f32 %v347_v55, %v937_v23  ;;  %v1233_v32 = vpop.permute.xlu0 %270  ;;  %v1532_v54 = vperm.slane %v1044_v62, 3 }
  0xc0   : > { %v559_v31 = vadd.f32 1.0, %v543_v39  ;;  %v426_v29 = vsub.f32 1.5, %v425_v56  ;;  %vm429_vm9 = vweird.f32 %v1172_v37  ;;  %762 = vrsqrt.f32 %v1228_v35 }
  0xc1   : > { %v1239_v49 = vsel %vm1050_vm5, %v1532_v54, 0.0  ;;  %v761_v16 = vpop.eup %760  ;;  %v573_v11 = vmax.f32 %v557_v0, 0.0  ;;  %v560_v21 = vadd.f32 1.0, %v544_v12  ;;  %vm430_vm12 = vmor %vm428_vm11, %vm429_vm9  ;;  %764 = vrsqrt.f32 %v1231_v33 }
  0xc2   : > { %v575_v23 = vmax.f32 %v559_v31, 0.0  ;;  %v427_v14 = vmul.f32 %v1172_v37, %v426_v29  ;;  %v413_v62 = vmul.f32 %v761_v16, %v1178_v60  ;;  %v334_v9 = vsel %vm323_vm0, %v296_v36, %v1174_v46 }
  0xc3   : > { %v619_v59 = vmul.f32 %v573_v11, %v832_v2  ;;  %v576_v26 = vmax.f32 %v560_v21, 0.0  ;;  %v349_v57 = vsel %vm1017_vm1, %v1136_v45, %v334_v9  ;;  %vm419_vm15 = vweird.f32 %v761_v16 }
  0xc4   : > { %v621_v42 = vmul.f32 %v575_v23, %v883_v13  ;;  %v431_v53 = vsel %vm430_vm12, %v1172_v37, %v427_v14  ;;  %v414_v48 = vmul.f32 %v761_v16, %v413_v62  ;;  %v1269_v13 = vsel %vm274_vm2, %v1010_v43, %v1248_v1 }
  0xc5   : > { %v635_v2 = vsel %vm603_vm10, %v619_v59, %v1144_v10  ;;  %v622_v50 = vmul.f32 %v576_v26, %v907_v18  ;;  %v546_v44 = vmul.f32 %v1085_v40, %v431_v53  ;;  %v1279_v55 = vadd.f32 %v349_v57, %v898_v17 }
  0xc6   : > { %651 = vst [vmem:[%s1190_s22] sm:$0xff] %v635_v2  ;;  %v637_v58 = vsel %vm605_vm13, %v621_v42, %v1153_v24  ;;  %v415_v37 = vmul.f32 0.5, %v414_v48  ;;  %v320_v63 = vpop.permute.xlu1 %319  ;;  %v1274_v39 = vpop.eup %762  ;;  %vm608_vm6 = vcmp.gt.f32.partialorder %v1128_v6, 0.0  ;;  %vm418_vm7 = vweird.f32 %v1178_v60 }
  0xc7   : > { %v638_v18 = vsel %vm606_vm14, %v622_v50, %v1239_v49  ;;  %653 = vst [vmem:[%s1190_s22 + $0x10] sm:$0xff] %v637_v58  ;;  %v562_v56 = vadd.f32 1.0, %v546_v44  ;;  %v338_v0 = vsel %vm323_vm0, %v320_v63, %v296_v36  ;;  %v312_v43 = vpop.permute.xlu0 %311  ;;  %v433_v45 = vmul.f32 %v1274_v39, %v1228_v35  ;;  %v765_v31 = vpop.eup %764  ;;  %vm420_vm8 = vmor %vm418_vm7, %vm419_vm15 }
  0xc8   : > { %654 = vst [vmem:[%s1190_s22 + $0x18] sm:$0xff] %v638_v18  ;;  %v416_v12 = vsub.f32 1.5, %v415_v37  ;;  %v348_v54 = vsel %vm1040_vm3, %v1108_v51, %v338_v0  ;;  %766 = vrsqrt.f32 %v1279_v55  ;;  %v443_v11 = vmul.f32 %v765_v31, %v1231_v33  ;;  %v1322_v48 = vpop.permute.xlu2 %305 }
  0xc9   : > { %v578_v29 = vmax.f32 %v562_v56, 0.0  ;;  %v434_v36 = vmul.f32 %v1274_v39, %v433_v45  ;;  %v277_v21 = vsel %vm274_vm2, %v1110_v52, %v1233_v32  ;;  %v1300_v23 = vadd.f32 %v348_v54, %v836_v3 }
  0xca   : > { %v417_v17 = vmul.f32 %v761_v16, %v416_v12  ;;  %v326_v14 = vsel %vm323_vm0, %v312_v43, %v320_v63  ;;  %v330_v62 = vsel %vm323_vm0, %v1174_v46, %v312_v43  ;;  %v444_v9 = vmul.f32 %v765_v31, %v443_v11 }
  0xcb   : > { %v624_v51 = vmul.f32 %v578_v29, %v856_v7  ;;  %v435_v26 = vmul.f32 0.5, %v434_v36  ;;  %v350_v42 = vsel %vm1046_vm4, %v277_v21, %v330_v62  ;;  %v289_v52 = vsel %vm274_vm2, %v1233_v32, %v1001_v34 }
  0xcc   : > { %v421_v59 = vsel %vm420_vm8, %v761_v16, %v417_v17  ;;  %768 = vrsqrt.f32 %v1300_v23  ;;  %vm439_vm9 = vweird.f32 %v1274_v39  ;;  %v445_v16 = vmul.f32 0.5, %v444_v9 }
  0xcd   : > { %v640_v7 = vsel %vm608_vm6, %v624_v51, %v1096_v19  ;;  %v545_v3 = vmul.f32 %v1121_v5, %v421_v59  ;;  %v436_v46 = vsub.f32 1.5, %v435_v26  ;;  %v351_v53 = vsel %vm1050_vm5, %v289_v52, %v326_v14 }
  0xce   : > { %656 = vst [vmem:[%s1190_s22 + $0x28] sm:$0xff] %v640_v7  ;;  %v298_v6 = vpop.permute.xlu1 %297  ;;  %v1324_v2 = vpop.eup %766  ;;  %vm438_vm10 = vweird.f32 %v1228_v35  ;;  %v1328_v34 = vadd.f32 %v350_v42, %v950_v25  ;;  %v1331_v32 = vadd.f32 %v351_v53, %v963_v27  ;;  %v446_v58 = vsub.f32 1.5, %v445_v16 }
  0xcf   : > { %v561_v50 = vadd.f32 1.0, %v545_v3  ;;  %v437_v44 = vmul.f32 %v1274_v39, %v436_v46  ;;  %vm449_vm11 = vweird.f32 %v765_v31  ;;  %v463_v37 = vmul.f32 %v1324_v2, %v1279_v55  ;;  %vm440_vm12 = vmor %vm438_vm10, %vm439_vm9  ;;  %v1343_v27 = vpop.permute.xlu0 %272 }
  0xd0   : > { %vm448_vm13 = vweird.f32 %v1231_v33  ;;  %770 = vrsqrt.f32 %v1328_v34  ;;  %v335_v25 = vsel %vm323_vm0, %v298_v6, %v1322_v48  ;;  %v447_v18 = vmul.f32 %v765_v31, %v446_v58 }
  0xd1   : > { %v577_v57 = vmax.f32 %v561_v50, 0.0  ;;  %v441_v63 = vsel %vm440_vm12, %v1274_v39, %v437_v44  ;;  %v464_v56 = vmul.f32 %v1324_v2, %v463_v37  ;;  %772 = vrsqrt.f32 %v1331_v32  ;;  %vm450_vm15 = vmor %vm448_vm13, %vm449_vm11  ;;  %v1533_v37 = vld [vmem:[#allocation14_spill] sm:$0xff] }
  0xd2   : > { %v1348_v0 = vpop.eup %768  ;;  %vm607_vm14 = vcmp.gt.f32.partialorder %v1178_v60, 0.0  ;;  %v547_v12 = vmul.f32 %v1123_v30, %v441_v63  ;;  %vm609_vm6 = vcmp.gt.f32.partialorder %v1228_v35, 0.0  ;;  %v451_v45 = vsel %vm450_vm15, %v765_v31, %v447_v18  ;;  %v1534_v18 = vld [vmem:[#allocation4_spill] sm:$0xff] }
  0xd3   : > { %v623_v43 = vmul.f32 %v577_v57, %v859_v8  ;;  %vm610_vm7 = vcmp.gt.f32.partialorder %v1231_v33, 0.0  ;;  %v465_v39 = vmul.f32 0.5, %v464_v56  ;;  %v453_v54 = vmul.f32 %v1348_v0, %v1300_v23 }
  0xd4   : > { %v548_v17 = vmul.f32 %v1125_v28, %v451_v45  ;;  %v563_v60 = vadd.f32 1.0, %v547_v12  ;;  %v353_v8 = vsel %vm1017_vm1, %v1269_v13, %v335_v25  ;;  %vm469_vm8 = vweird.f32 %v1324_v2 }
  0xd5   : > { %v639_v29 = vsel %vm607_vm14, %v623_v43, %v1144_v10  ;;  %v466_v36 = vsub.f32 1.5, %v465_v39  ;;  %v454_v31 = vmul.f32 %v1348_v0, %v453_v54  ;;  %v1367_v11 = vadd.f32 %v353_v8, %v890_v15 }
  0xd6   : > { %655 = vst [vmem:[%s1190_s22 + $0x20] sm:$0xff] %v639_v29  ;;  %v322_v21 = vpop.permute.xlu1 %321  ;;  %v1369_v51 = vpop.eup %770  ;;  %v564_v14 = vadd.f32 1.0, %v548_v17  ;;  %v579_v62 = vmax.f32 %v563_v60, 0.0  ;;  %vm468_vm9 = vweird.f32 %v1279_v55  ;;  %vm458_vm10 = vweird.f32 %v1300_v23  ;;  %v1535_v29 = vld [vmem:[#allocation13_spill] sm:$0xff]  ;;  %v1536_v60 = vld [vmem:[#allocation6_spill] sm:$0xff] }
  0xd7   : > { %v773_v47 = vpop.eup %772  ;;  %v467_v13 = vmul.f32 %v1324_v2, %v466_v36  ;;  %v455_v59 = vmul.f32 0.5, %v454_v31  ;;  %vm459_vm1 = vweird.f32 %v1348_v0  ;;  %v473_v26 = vmul.f32 %v1369_v51, %v1328_v34  ;;  %vm470_vm12 = vmor %vm468_vm9, %vm469_vm8  ;;  %v314_v44 = vpop.permute.xlu0 %313 }
  0xd8   : > { %vm478_vm11 = vweird.f32 %v1328_v34  ;;  %v580_v15 = vmax.f32 %v564_v14, 0.0  ;;  %v625_v9 = vmul.f32 %v579_v62, %v920_v20  ;;  %v483_v42 = vmul.f32 %v773_v47, %v1331_v32 }
  0xd9   : > { %vm488_vm13 = vweird.f32 %v1331_v32  ;;  %v339_v7 = vsel %vm323_vm0, %v322_v21, %v298_v6  ;;  %v471_v3 = vsel %vm470_vm12, %v1324_v2, %v467_v13  ;;  %v456_v52 = vsub.f32 1.5, %v455_v59  ;;  %v1537_v59 = vld [vmem:[#allocation10_spill] sm:$0xff] }
  0xda   : > { %v474_v46 = vmul.f32 %v1369_v51, %v473_v26  ;;  %774 = vrsqrt.f32 %v1367_v11  ;;  %v626_v20 = vmul.f32 %v580_v15, %v933_v22  ;;  %v641_v16 = vsel %vm609_vm6, %v625_v9, %v1153_v24  ;;  %vm460_vm6 = vmor %vm458_vm10, %vm459_vm1  ;;  %v1538_v15 = vld [vmem:[#allocation12_spill] sm:$0xff]  ;;  %v1539_v9 = vld [vmem:[#allocation2_spill] sm:$0xff] }
  0xdb   : > { %v550_v53 = vmul.f32 %v1085_v40, %v471_v3  ;;  %v484_v50 = vmul.f32 %v773_v47, %v483_v42  ;;  %657 = vst [vmem:[%s1190_s22 + $0x30] sm:$0xff] %v641_v16  ;;  %v457_v6 = vmul.f32 %v1348_v0, %v456_v52  ;;  %vm479_vm14 = vweird.f32 %v1369_v51 }
  0xdc   : > { %v475_v2 = vmul.f32 0.5, %v474_v46  ;;  %vm489_vm15 = vweird.f32 %v773_v47  ;;  %v642_v58 = vsel %vm610_vm7, %v626_v20, %v1239_v49  ;;  %v352_v57 = vsel %vm1040_vm3, %v1533_v37, %v339_v7 }
  0xdd   : > { %v566_v22 = vadd.f32 1.0, %v550_v53  ;;  %v485_v35 = vmul.f32 0.5, %v484_v50  ;;  %658 = vst [vmem:[%s1190_s22 + $0x38] sm:$0xff] %v642_v58  ;;  %v461_v25 = vsel %vm460_vm6, %v1348_v0, %v457_v6  ;;  %v1409_v56 = vadd.f32 %v352_v57, %v1534_v18  ;;  %v1540_v50 = vld [vmem:[#allocation7_spill] sm:$0xff]  ;;  %v1541_v6 = vld [vmem:[#allocation8_spill] sm:$0xff] }
  0xde   : > { %v476_v63 = vsub.f32 1.5, %v475_v2  ;;  %v327_v33 = vsel %vm323_vm0, %v314_v44, %v322_v21  ;;  %v549_v12 = vmul.f32 %v1121_v5, %v461_v25  ;;  %v331_v39 = vsel %vm323_vm0, %v1322_v48, %v314_v44  ;;  %vm480_vm0 = vmor %vm478_vm11, %vm479_vm14 }
  0xdf   : > { %v582_v43 = vmax.f32 %v566_v22, 0.0  ;;  %v486_v45 = vsub.f32 1.5, %v485_v35  ;;  %v278_v0 = vsel %vm274_vm2, %v1248_v1, %v1343_v27  ;;  %v290_v17 = vsel %vm274_vm2, %v1343_v27, %v1535_v29  ;;  %vm490_vm2 = vmor %vm488_vm13, %vm489_vm15  ;;  %v1542_v29 = vld [vmem:[#allocation5_spill] sm:$0xff] }
  0xe0   : > { %v775_v61 = vpop.eup %774  ;;  %v477_v54 = vmul.f32 %v1369_v51, %v476_v63  ;;  %776 = vrsqrt.f32 %v1409_v56  ;;  %v565_v36 = vadd.f32 1.0, %v549_v12  ;;  %vm612_vm3 = vcmp.gt.f32.partialorder %v1279_v55, 0.0 }
  0xe1   : > { %v628_v8 = vmul.f32 %v582_v43, %v1536_v60  ;;  %v487_v48 = vmul.f32 %v773_v47, %v486_v45  ;;  %v503_v31 = vmul.f32 %v775_v61, %v1367_v11  ;;  %v354_v41 = vsel %vm1046_vm4, %v278_v0, %v331_v39 }
  0xe2   : > { %v481_v1 = vsel %vm480_vm0, %v1369_v51, %v477_v54  ;;  %v355_v27 = vsel %vm1050_vm5, %v290_v17, %v327_v33  ;;  %v581_v14 = vmax.f32 %v565_v36, 0.0  ;;  %v1447_v26 = vadd.f32 %v354_v41, %v1537_v59 }
  0xe3   : > { %v644_v21 = vsel %vm612_vm3, %v628_v8, %v1096_v19  ;;  %v491_v62 = vsel %vm490_vm2, %v773_v47, %v487_v48  ;;  %v551_v13 = vmul.f32 %v1123_v30, %v481_v1  ;;  %v504_v51 = vmul.f32 %v775_v61, %v503_v31 }
  0xe4   : > { %660 = vst [vmem:[%s1190_s22 + $0x48] sm:$0xff] %v644_v21  ;;  %v552_v55 = vmul.f32 %v1125_v28, %v491_v62  ;;  %v1450_v4 = vadd.f32 %v355_v27, %v1538_v15  ;;  %v627_v38 = vmul.f32 %v581_v14, %v1539_v9  ;;  %vm611_vm4 = vcmp.gt.f32.partialorder %v1300_v23, 0.0  ;;  %v1543_v21 = vld [vmem:[#allocation3_spill] sm:$0xff]  ;;  %v1544_v9 = vld [vmem:[#allocation9_spill] sm:$0xff] }
  0xe5   : > { %v567_v42 = vadd.f32 1.0, %v551_v13  ;;  %v505_v3 = vmul.f32 0.5, %v504_v51  ;;  %778 = vrsqrt.f32 %v1447_v26  ;;  %vm509_vm5 = vweird.f32 %v775_v61 }
  0xe6   : > { %v777_v7 = vpop.eup %776  ;;  %v568_v47 = vadd.f32 1.0, %v552_v55  ;;  %v643_v52 = vsel %vm611_vm4, %v627_v38, %v1144_v10  ;;  %780 = vrsqrt.f32 %v1450_v4  ;;  %vm613_vm7 = vcmp.gt.f32.partialorder %v1328_v34, 0.0 }
  0xe7   : > { %v583_v46 = vmax.f32 %v567_v42, 0.0  ;;  %v493_v20 = vmul.f32 %v777_v7, %v1409_v56  ;;  %659 = vst [vmem:[%s1190_s22 + $0x40] sm:$0xff] %v643_v52  ;;  %v506_v53 = vsub.f32 1.5, %v505_v3  ;;  %vm508_vm8 = vweird.f32 %v1367_v11  ;;  %v1545_v42 = vld [vmem:[#allocation11_spill] sm:$0xff] }
  0xe8   : > { %v584_v16 = vmax.f32 %v568_v47, 0.0  ;;  %vm614_vm9 = vcmp.gt.f32.partialorder %v1331_v32, 0.0  ;;  %vm510_vm10 = vmor %vm508_vm8, %vm509_vm5  ;;  %vm499_vm1 = vweird.f32 %v777_v7  ;;  %vm498_vm11 = vweird.f32 %v1409_v56 }
  0xe9   : > { %v629_v44 = vmul.f32 %v583_v46, %v1540_v50  ;;  %v494_v23 = vmul.f32 %v777_v7, %v493_v20  ;;  %v507_v58 = vmul.f32 %v775_v61, %v506_v53  ;;  %vm500_vm12 = vmor %vm498_vm11, %vm499_vm1  ;;  %vm616_vm14 = vcmp.gt.f32.partialorder %v1367_v11, 0.0 }
  0xea   : > { %v630_v2 = vmul.f32 %v584_v16, %v1541_v6  ;;  %vm518_vm15 = vweird.f32 %v1447_v26  ;;  %vm528_vm3 = vweird.f32 %v1450_v4  ;;  %vm615_vm4 = vcmp.gt.f32.partialorder %v1409_v56, 0.0 }
  0xeb   : > { %v645_v22 = vsel %vm613_vm7, %v629_v44, %v1153_v24  ;;  %v495_v35 = vmul.f32 0.5, %v494_v23  ;;  %v779_v37 = vpop.eup %778  ;;  %v511_v25 = vsel %vm510_vm10, %v775_v61, %v507_v58  ;;  %vm617_vm5 = vcmp.gt.f32.partialorder %v1447_v26, 0.0 }
  0xec   : > { %v646_v57 = vsel %vm614_vm9, %v630_v2, %v1239_v49  ;;  %661 = vst [vmem:[%s1190_s22 + $0x50] sm:$0xff] %v645_v22  ;;  %v554_v63 = vmul.f32 %v1085_v40, %v511_v25  ;;  %v513_v18 = vmul.f32 %v779_v37, %v1447_v26  ;;  %v781_v33 = vpop.eup %780  ;;  %vm519_vm13 = vweird.f32 %v779_v37 }
  0xed   : > { %662 = vst [vmem:[%s1190_s22 + $0x58] sm:$0xff] %v646_v57  ;;  %v496_v34 = vsub.f32 1.5, %v495_v35  ;;  %v523_v45 = vmul.f32 %v781_v33, %v1450_v4  ;;  %vm529_vm6 = vweird.f32 %v781_v33  ;;  %vm520_vm0 = vmor %vm518_vm15, %vm519_vm13  ;;  %vm618_vm7 = vcmp.gt.f32.partialorder %v1450_v4, 0.0 }
  0xee   : > { %v570_v32 = vadd.f32 1.0, %v554_v63  ;;  %v514_v12 = vmul.f32 %v779_v37, %v513_v18  ;;  %vm530_vm2 = vmor %vm528_vm3, %vm529_vm6 }
  0xef   : > { %v497_v43 = vmul.f32 %v777_v7, %v496_v34  ;;  %v524_v0 = vmul.f32 %v781_v33, %v523_v45 }
  0xf0   : > { %v586_v39 = vmax.f32 %v570_v32, 0.0  ;;  %v515_v61 = vmul.f32 0.5, %v514_v12 }
  0xf1   : > { %v501_v54 = vsel %vm500_vm12, %v777_v7, %v497_v43  ;;  %v525_v8 = vmul.f32 0.5, %v524_v0 }
  0xf2   : > { %v553_v40 = vmul.f32 %v1121_v5, %v501_v54  ;;  %v632_v17 = vmul.f32 %v586_v39, %v1542_v29  ;;  %v516_v60 = vsub.f32 1.5, %v515_v61 }
  0xf3   : > { %v526_v1 = vsub.f32 1.5, %v525_v8 }
  0xf4   : > { %v569_v36 = vadd.f32 1.0, %v553_v40  ;;  %v648_v48 = vsel %vm616_vm14, %v632_v17, %v1096_v19  ;;  %v517_v31 = vmul.f32 %v779_v37, %v516_v60 }
  0xf5   : > { %664 = vst [vmem:[%s1190_s22 + $0x68] sm:$0xff] %v648_v48  ;;  %v527_v27 = vmul.f32 %v781_v33, %v526_v1 }
  0xf6   : > { %v585_v41 = vmax.f32 %v569_v36, 0.0  ;;  %v521_v5 = vsel %vm520_vm0, %v779_v37, %v517_v31 }
  0xf7   : > { %v555_v11 = vmul.f32 %v1123_v30, %v521_v5  ;;  %v531_v19 = vsel %vm530_vm2, %v781_v33, %v527_v27 }
  0xf8   : > { %v631_v14 = vmul.f32 %v585_v41, %v1543_v21  ;;  %v556_v13 = vmul.f32 %v1125_v28, %v531_v19 }
  0xf9   : > { %v571_v55 = vadd.f32 1.0, %v555_v11 }
  0xfa   : > { %v647_v62 = vsel %vm615_vm4, %v631_v14, %v1144_v10  ;;  %v572_v51 = vadd.f32 1.0, %v556_v13 }
  0xfb   : > { %663 = vst [vmem:[%s1190_s22 + $0x60] sm:$0xff] %v647_v62  ;;  %v587_v59 = vmax.f32 %v571_v55, 0.0 }
  0xfc   : > { %v588_v15 = vmax.f32 %v572_v51, 0.0 }
  0xfd   : > { %v633_v38 = vmul.f32 %v587_v59, %v1544_v9 }
  0xfe   : > { %v634_v7 = vmul.f32 %v588_v15, %v1545_v42 }
  0xff   : > { %v649_v30 = vsel %vm617_vm5, %v633_v38, %v1153_v24 }
 0x100   : > { %665 = vst [vmem:[%s1190_s22 + $0x70] sm:$0xff] %v649_v30  ;;  %v650_v10 = vsel %vm618_vm7, %v634_v7, %v1239_v49 }
 0x101   : > { %666 = vst [vmem:[%s1190_s22 + $0x78] sm:$0xff] %v650_v10 }
 0x102 PF: > { %s12_s9 = sadd.s32 1, %s788_s9  }
 0x103   : > { %p9_p4 = scmp.ge.s32.totalorder %s12_s9, 4  }
 0x105   :  { %11 = sbr.rel (!%p9_p4) target bundleno = 1 (0x1), region = 58 }

// kernel: custom-call.2
= control target key start
LH: loop header
LB: loop body
LE: loop exit
PB: predicated region body
PF: predicated region fallthrough
CT: control target
= control target key end

     0   :  { %s1611_s0 = inlined_call_operand.vmem [shape: f32[2,32,32,8], index: 0, kind: input, shape index: {}]   ;;  %s1612_s2 = inlined_call_operand.vmem [shape: c64[2,32,32,8], index: 2, kind: output, shape index: {}]   ;;  %s1613_s1 = inlined_call_operand.vmem [shape: f32[2,32,32,8], index: 1, kind: input, shape index: {}]  }
   0x1   :  { %v4_v0 = vld [vmem:[%s1611_s0] sm:$0xff]  ;;  %v575_v1 = vld [vmem:[%s1611_s0 + $0x8] sm:$0xff]  ;;  %v577_v2 = vld [vmem:[%s1611_s0 + $0x10] sm:$0xff] }
   0x2   :  { %5 = vst [vmem:[%s1612_s2] sm:$0xff] %v4_v0  ;;  %v579_v3 = vld [vmem:[%s1611_s0 + $0x18] sm:$0xff]  ;;  %v581_v4 = vld [vmem:[%s1611_s0 + $0x20] sm:$0xff]  ;;  %v583_v5 = vld [vmem:[%s1611_s0 + $0x28] sm:$0xff] }
   0x3   :  { %576 = vst [vmem:[%s1612_s2 + $0x8] sm:$0xff] %v575_v1  ;;  %v585_v6 = vld [vmem:[%s1611_s0 + $0x30] sm:$0xff]  ;;  %v587_v7 = vld [vmem:[%s1611_s0 + $0x38] sm:$0xff]  ;;  %v589_v8 = vld [vmem:[%s1611_s0 + $0x40] sm:$0xff] }
   0x4   :  { %578 = vst [vmem:[%s1612_s2 + $0x10] sm:$0xff] %v577_v2  ;;  %v591_v9 = vld [vmem:[%s1611_s0 + $0x48] sm:$0xff]  ;;  %v593_v10 = vld [vmem:[%s1611_s0 + $0x50] sm:$0xff]  ;;  %v595_v11 = vld [vmem:[%s1611_s0 + $0x58] sm:$0xff] }
   0x5   :  { %580 = vst [vmem:[%s1612_s2 + $0x18] sm:$0xff] %v579_v3  ;;  %v597_v12 = vld [vmem:[%s1611_s0 + $0x60] sm:$0xff]  ;;  %v599_v13 = vld [vmem:[%s1611_s0 + $0x68] sm:$0xff]  ;;  %v601_v14 = vld [vmem:[%s1611_s0 + $0x70] sm:$0xff] }
   0x6   :  { %582 = vst [vmem:[%s1612_s2 + $0x20] sm:$0xff] %v581_v4  ;;  %v603_v15 = vld [vmem:[%s1611_s0 + $0x78] sm:$0xff]  ;;  %v605_v16 = vld [vmem:[%s1611_s0 + $0x80] sm:$0xff]  ;;  %v607_v17 = vld [vmem:[%s1611_s0 + $0x88] sm:$0xff] }
   0x7   :  { %584 = vst [vmem:[%s1612_s2 + $0x28] sm:$0xff] %v583_v5  ;;  %v609_v18 = vld [vmem:[%s1611_s0 + $0x90] sm:$0xff]  ;;  %v611_v19 = vld [vmem:[%s1611_s0 + $0x98] sm:$0xff]  ;;  %v613_v20 = vld [vmem:[%s1611_s0 + $0xa0] sm:$0xff] }
   0x8   :  { %586 = vst [vmem:[%s1612_s2 + $0x30] sm:$0xff] %v585_v6  ;;  %v615_v21 = vld [vmem:[%s1611_s0 + $0xa8] sm:$0xff]  ;;  %v617_v22 = vld [vmem:[%s1611_s0 + $0xb0] sm:$0xff]  ;;  %v619_v23 = vld [vmem:[%s1611_s0 + $0xb8] sm:$0xff] }
   0x9   :  { %588 = vst [vmem:[%s1612_s2 + $0x38] sm:$0xff] %v587_v7  ;;  %v621_v24 = vld [vmem:[%s1611_s0 + $0xc0] sm:$0xff]  ;;  %v623_v25 = vld [vmem:[%s1611_s0 + $0xc8] sm:$0xff]  ;;  %v625_v26 = vld [vmem:[%s1611_s0 + $0xd0] sm:$0xff] }
   0xa   :  { %590 = vst [vmem:[%s1612_s2 + $0x40] sm:$0xff] %v589_v8  ;;  %v627_v27 = vld [vmem:[%s1611_s0 + $0xd8] sm:$0xff]  ;;  %v629_v28 = vld [vmem:[%s1611_s0 + $0xe0] sm:$0xff]  ;;  %v631_v29 = vld [vmem:[%s1611_s0 + $0xe8] sm:$0xff] }
   0xb   :  { %592 = vst [vmem:[%s1612_s2 + $0x48] sm:$0xff] %v591_v9  ;;  %v633_v30 = vld [vmem:[%s1611_s0 + $0xf0] sm:$0xff]  ;;  %v635_v31 = vld [vmem:[%s1611_s0 + $0xf8] sm:$0xff]  ;;  %v637_v32 = vld [vmem:[%s1611_s0 + $0x100] sm:$0xff] }
   0xc   :  { %594 = vst [vmem:[%s1612_s2 + $0x50] sm:$0xff] %v593_v10  ;;  %v639_v33 = vld [vmem:[%s1611_s0 + $0x108] sm:$0xff]  ;;  %v641_v34 = vld [vmem:[%s1611_s0 + $0x110] sm:$0xff]  ;;  %v643_v35 = vld [vmem:[%s1611_s0 + $0x118] sm:$0xff] }
   0xd   :  { %596 = vst [vmem:[%s1612_s2 + $0x58] sm:$0xff] %v595_v11  ;;  %v645_v36 = vld [vmem:[%s1611_s0 + $0x120] sm:$0xff]  ;;  %v647_v37 = vld [vmem:[%s1611_s0 + $0x128] sm:$0xff]  ;;  %v649_v38 = vld [vmem:[%s1611_s0 + $0x130] sm:$0xff] }
   0xe   :  { %598 = vst [vmem:[%s1612_s2 + $0x60] sm:$0xff] %v597_v12  ;;  %v651_v39 = vld [vmem:[%s1611_s0 + $0x138] sm:$0xff]  ;;  %v653_v40 = vld [vmem:[%s1611_s0 + $0x140] sm:$0xff]  ;;  %v655_v41 = vld [vmem:[%s1611_s0 + $0x148] sm:$0xff] }
   0xf   :  { %600 = vst [vmem:[%s1612_s2 + $0x68] sm:$0xff] %v599_v13  ;;  %v657_v42 = vld [vmem:[%s1611_s0 + $0x150] sm:$0xff]  ;;  %v659_v43 = vld [vmem:[%s1611_s0 + $0x158] sm:$0xff]  ;;  %v661_v44 = vld [vmem:[%s1611_s0 + $0x160] sm:$0xff] }
  0x10   :  { %602 = vst [vmem:[%s1612_s2 + $0x70] sm:$0xff] %v601_v14  ;;  %v663_v45 = vld [vmem:[%s1611_s0 + $0x168] sm:$0xff]  ;;  %v665_v46 = vld [vmem:[%s1611_s0 + $0x170] sm:$0xff]  ;;  %v667_v47 = vld [vmem:[%s1611_s0 + $0x178] sm:$0xff] }
  0x11   :  { %604 = vst [vmem:[%s1612_s2 + $0x78] sm:$0xff] %v603_v15  ;;  %v669_v48 = vld [vmem:[%s1611_s0 + $0x180] sm:$0xff]  ;;  %v671_v49 = vld [vmem:[%s1611_s0 + $0x188] sm:$0xff]  ;;  %v673_v50 = vld [vmem:[%s1611_s0 + $0x190] sm:$0xff] }
  0x12   :  { %606 = vst [vmem:[%s1612_s2 + $0x80] sm:$0xff] %v605_v16  ;;  %v675_v51 = vld [vmem:[%s1611_s0 + $0x198] sm:$0xff]  ;;  %v677_v52 = vld [vmem:[%s1611_s0 + $0x1a0] sm:$0xff]  ;;  %v679_v53 = vld [vmem:[%s1611_s0 + $0x1a8] sm:$0xff] }
  0x13   :  { %608 = vst [vmem:[%s1612_s2 + $0x88] sm:$0xff] %v607_v17  ;;  %v681_v54 = vld [vmem:[%s1611_s0 + $0x1b0] sm:$0xff]  ;;  %v683_v55 = vld [vmem:[%s1611_s0 + $0x1b8] sm:$0xff]  ;;  %v685_v56 = vld [vmem:[%s1611_s0 + $0x1c0] sm:$0xff] }
  0x14   :  { %610 = vst [vmem:[%s1612_s2 + $0x90] sm:$0xff] %v609_v18  ;;  %v687_v57 = vld [vmem:[%s1611_s0 + $0x1c8] sm:$0xff]  ;;  %v689_v58 = vld [vmem:[%s1611_s0 + $0x1d0] sm:$0xff]  ;;  %v691_v59 = vld [vmem:[%s1611_s0 + $0x1d8] sm:$0xff] }
  0x15   :  { %612 = vst [vmem:[%s1612_s2 + $0x98] sm:$0xff] %v611_v19  ;;  %v693_v60 = vld [vmem:[%s1611_s0 + $0x1e0] sm:$0xff]  ;;  %v695_v61 = vld [vmem:[%s1611_s0 + $0x1e8] sm:$0xff]  ;;  %v697_v62 = vld [vmem:[%s1611_s0 + $0x1f0] sm:$0xff] }
  0x16   :  { %614 = vst [vmem:[%s1612_s2 + $0xa0] sm:$0xff] %v613_v20  ;;  %v699_v63 = vld [vmem:[%s1611_s0 + $0x1f8] sm:$0xff]  ;;  %v258_v0 = vld [vmem:[%s1613_s1] sm:$0xff]  ;;  %v702_v1 = vld [vmem:[%s1613_s1 + $0x8] sm:$0xff] }
  0x17   :  { %616 = vst [vmem:[%s1612_s2 + $0xa8] sm:$0xff] %v615_v21  ;;  %v704_v2 = vld [vmem:[%s1613_s1 + $0x10] sm:$0xff]  ;;  %v706_v3 = vld [vmem:[%s1613_s1 + $0x18] sm:$0xff]  ;;  %v708_v4 = vld [vmem:[%s1613_s1 + $0x20] sm:$0xff] }
  0x18   :  { %618 = vst [vmem:[%s1612_s2 + $0xb0] sm:$0xff] %v617_v22  ;;  %v710_v5 = vld [vmem:[%s1613_s1 + $0x28] sm:$0xff]  ;;  %v712_v6 = vld [vmem:[%s1613_s1 + $0x30] sm:$0xff]  ;;  %v714_v7 = vld [vmem:[%s1613_s1 + $0x38] sm:$0xff] }
  0x19   :  { %620 = vst [vmem:[%s1612_s2 + $0xb8] sm:$0xff] %v619_v23  ;;  %v716_v8 = vld [vmem:[%s1613_s1 + $0x40] sm:$0xff]  ;;  %v718_v9 = vld [vmem:[%s1613_s1 + $0x48] sm:$0xff]  ;;  %v720_v10 = vld [vmem:[%s1613_s1 + $0x50] sm:$0xff] }
  0x1a   :  { %622 = vst [vmem:[%s1612_s2 + $0xc0] sm:$0xff] %v621_v24  ;;  %v722_v11 = vld [vmem:[%s1613_s1 + $0x58] sm:$0xff]  ;;  %v724_v12 = vld [vmem:[%s1613_s1 + $0x60] sm:$0xff]  ;;  %v726_v13 = vld [vmem:[%s1613_s1 + $0x68] sm:$0xff] }
  0x1b   :  { %624 = vst [vmem:[%s1612_s2 + $0xc8] sm:$0xff] %v623_v25  ;;  %v728_v14 = vld [vmem:[%s1613_s1 + $0x70] sm:$0xff]  ;;  %v730_v15 = vld [vmem:[%s1613_s1 + $0x78] sm:$0xff]  ;;  %v732_v16 = vld [vmem:[%s1613_s1 + $0x80] sm:$0xff] }
  0x1c   :  { %626 = vst [vmem:[%s1612_s2 + $0xd0] sm:$0xff] %v625_v26  ;;  %v734_v17 = vld [vmem:[%s1613_s1 + $0x88] sm:$0xff]  ;;  %v736_v18 = vld [vmem:[%s1613_s1 + $0x90] sm:$0xff]  ;;  %v738_v19 = vld [vmem:[%s1613_s1 + $0x98] sm:$0xff] }
  0x1d   :  { %628 = vst [vmem:[%s1612_s2 + $0xd8] sm:$0xff] %v627_v27  ;;  %v740_v20 = vld [vmem:[%s1613_s1 + $0xa0] sm:$0xff]  ;;  %v742_v21 = vld [vmem:[%s1613_s1 + $0xa8] sm:$0xff]  ;;  %v744_v22 = vld [vmem:[%s1613_s1 + $0xb0] sm:$0xff] }
  0x1e   :  { %630 = vst [vmem:[%s1612_s2 + $0xe0] sm:$0xff] %v629_v28  ;;  %v746_v23 = vld [vmem:[%s1613_s1 + $0xb8] sm:$0xff]  ;;  %v748_v24 = vld [vmem:[%s1613_s1 + $0xc0] sm:$0xff]  ;;  %v750_v25 = vld [vmem:[%s1613_s1 + $0xc8] sm:$0xff] }
  0x1f   :  { %632 = vst [vmem:[%s1612_s2 + $0xe8] sm:$0xff] %v631_v29  ;;  %v752_v26 = vld [vmem:[%s1613_s1 + $0xd0] sm:$0xff]  ;;  %v754_v27 = vld [vmem:[%s1613_s1 + $0xd8] sm:$0xff]  ;;  %v756_v28 = vld [vmem:[%s1613_s1 + $0xe0] sm:$0xff] }
  0x20   :  { %634 = vst [vmem:[%s1612_s2 + $0xf0] sm:$0xff] %v633_v30  ;;  %v758_v29 = vld [vmem:[%s1613_s1 + $0xe8] sm:$0xff]  ;;  %v760_v30 = vld [vmem:[%s1613_s1 + $0xf0] sm:$0xff] }
  0x21   :  { %636 = vst [vmem:[%s1612_s2 + $0xf8] sm:$0xff] %v635_v31  ;;  %v762_v31 = vld [vmem:[%s1613_s1 + $0xf8] sm:$0xff] }
  0x22   :  { %638 = vst [vmem:[%s1612_s2 + $0x100] sm:$0xff] %v637_v32  ;;  %v764_v32 = vld [vmem:[%s1613_s1 + $0x100] sm:$0xff] }
  0x23   :  { %640 = vst [vmem:[%s1612_s2 + $0x108] sm:$0xff] %v639_v33  ;;  %v766_v33 = vld [vmem:[%s1613_s1 + $0x108] sm:$0xff] }
  0x24   :  { %642 = vst [vmem:[%s1612_s2 + $0x110] sm:$0xff] %v641_v34  ;;  %v768_v34 = vld [vmem:[%s1613_s1 + $0x110] sm:$0xff] }
  0x25   :  { %644 = vst [vmem:[%s1612_s2 + $0x118] sm:$0xff] %v643_v35  ;;  %v770_v35 = vld [vmem:[%s1613_s1 + $0x118] sm:$0xff] }
  0x26   :  { %646 = vst [vmem:[%s1612_s2 + $0x120] sm:$0xff] %v645_v36  ;;  %v772_v36 = vld [vmem:[%s1613_s1 + $0x120] sm:$0xff] }
  0x27   :  { %648 = vst [vmem:[%s1612_s2 + $0x128] sm:$0xff] %v647_v37  ;;  %v774_v37 = vld [vmem:[%s1613_s1 + $0x128] sm:$0xff] }
  0x28   :  { %650 = vst [vmem:[%s1612_s2 + $0x130] sm:$0xff] %v649_v38  ;;  %v776_v38 = vld [vmem:[%s1613_s1 + $0x130] sm:$0xff] }
  0x29   :  { %652 = vst [vmem:[%s1612_s2 + $0x138] sm:$0xff] %v651_v39  ;;  %v778_v39 = vld [vmem:[%s1613_s1 + $0x138] sm:$0xff] }
  0x2a   :  { %654 = vst [vmem:[%s1612_s2 + $0x140] sm:$0xff] %v653_v40  ;;  %v780_v40 = vld [vmem:[%s1613_s1 + $0x140] sm:$0xff] }
  0x2b   :  { %656 = vst [vmem:[%s1612_s2 + $0x148] sm:$0xff] %v655_v41  ;;  %v782_v41 = vld [vmem:[%s1613_s1 + $0x148] sm:$0xff] }
  0x2c   :  { %658 = vst [vmem:[%s1612_s2 + $0x150] sm:$0xff] %v657_v42  ;;  %v784_v42 = vld [vmem:[%s1613_s1 + $0x150] sm:$0xff] }
  0x2d   :  { %660 = vst [vmem:[%s1612_s2 + $0x158] sm:$0xff] %v659_v43  ;;  %v786_v43 = vld [vmem:[%s1613_s1 + $0x158] sm:$0xff] }
  0x2e   :  { %662 = vst [vmem:[%s1612_s2 + $0x160] sm:$0xff] %v661_v44  ;;  %v788_v44 = vld [vmem:[%s1613_s1 + $0x160] sm:$0xff] }
  0x2f   :  { %664 = vst [vmem:[%s1612_s2 + $0x168] sm:$0xff] %v663_v45  ;;  %v790_v45 = vld [vmem:[%s1613_s1 + $0x168] sm:$0xff] }
  0x30   :  { %666 = vst [vmem:[%s1612_s2 + $0x170] sm:$0xff] %v665_v46  ;;  %v792_v46 = vld [vmem:[%s1613_s1 + $0x170] sm:$0xff] }
  0x31   :  { %668 = vst [vmem:[%s1612_s2 + $0x178] sm:$0xff] %v667_v47  ;;  %v794_v47 = vld [vmem:[%s1613_s1 + $0x178] sm:$0xff] }
  0x32   :  { %670 = vst [vmem:[%s1612_s2 + $0x180] sm:$0xff] %v669_v48  ;;  %v796_v48 = vld [vmem:[%s1613_s1 + $0x180] sm:$0xff] }
  0x33   :  { %672 = vst [vmem:[%s1612_s2 + $0x188] sm:$0xff] %v671_v49  ;;  %v798_v49 = vld [vmem:[%s1613_s1 + $0x188] sm:$0xff] }
  0x34   :  { %674 = vst [vmem:[%s1612_s2 + $0x190] sm:$0xff] %v673_v50  ;;  %v800_v50 = vld [vmem:[%s1613_s1 + $0x190] sm:$0xff] }
  0x35   :  { %676 = vst [vmem:[%s1612_s2 + $0x198] sm:$0xff] %v675_v51  ;;  %v802_v51 = vld [vmem:[%s1613_s1 + $0x198] sm:$0xff] }
  0x36   :  { %678 = vst [vmem:[%s1612_s2 + $0x1a0] sm:$0xff] %v677_v52  ;;  %v804_v52 = vld [vmem:[%s1613_s1 + $0x1a0] sm:$0xff] }
  0x37   :  { %680 = vst [vmem:[%s1612_s2 + $0x1a8] sm:$0xff] %v679_v53  ;;  %v806_v53 = vld [vmem:[%s1613_s1 + $0x1a8] sm:$0xff] }
  0x38   :  { %682 = vst [vmem:[%s1612_s2 + $0x1b0] sm:$0xff] %v681_v54  ;;  %v808_v54 = vld [vmem:[%s1613_s1 + $0x1b0] sm:$0xff] }
  0x39   :  { %684 = vst [vmem:[%s1612_s2 + $0x1b8] sm:$0xff] %v683_v55  ;;  %v810_v55 = vld [vmem:[%s1613_s1 + $0x1b8] sm:$0xff] }
  0x3a   :  { %686 = vst [vmem:[%s1612_s2 + $0x1c0] sm:$0xff] %v685_v56  ;;  %v812_v56 = vld [vmem:[%s1613_s1 + $0x1c0] sm:$0xff] }
  0x3b   :  { %688 = vst [vmem:[%s1612_s2 + $0x1c8] sm:$0xff] %v687_v57  ;;  %v814_v57 = vld [vmem:[%s1613_s1 + $0x1c8] sm:$0xff] }
  0x3c   :  { %690 = vst [vmem:[%s1612_s2 + $0x1d0] sm:$0xff] %v689_v58  ;;  %v816_v58 = vld [vmem:[%s1613_s1 + $0x1d0] sm:$0xff] }
  0x3d   :  { %692 = vst [vmem:[%s1612_s2 + $0x1d8] sm:$0xff] %v691_v59  ;;  %v818_v59 = vld [vmem:[%s1613_s1 + $0x1d8] sm:$0xff] }
  0x3e   :  { %694 = vst [vmem:[%s1612_s2 + $0x1e0] sm:$0xff] %v693_v60  ;;  %v820_v60 = vld [vmem:[%s1613_s1 + $0x1e0] sm:$0xff] }
  0x3f   :  { %696 = vst [vmem:[%s1612_s2 + $0x1e8] sm:$0xff] %v695_v61  ;;  %v822_v61 = vld [vmem:[%s1613_s1 + $0x1e8] sm:$0xff] }
  0x40   :  { %698 = vst [vmem:[%s1612_s2 + $0x1f0] sm:$0xff] %v697_v62  ;;  %v824_v62 = vld [vmem:[%s1613_s1 + $0x1f0] sm:$0xff] }
  0x41   :  { %700 = vst [vmem:[%s1612_s2 + $0x1f8] sm:$0xff] %v699_v63  ;;  %v826_v63 = vld [vmem:[%s1613_s1 + $0x1f8] sm:$0xff] }
  0x42   :  { %701 = vst [vmem:[%s1612_s2 + $0x200] sm:$0xff] %v258_v0 }
  0x43   :  { %703 = vst [vmem:[%s1612_s2 + $0x208] sm:$0xff] %v702_v1 }
  0x44   :  { %705 = vst [vmem:[%s1612_s2 + $0x210] sm:$0xff] %v704_v2 }
  0x45   :  { %707 = vst [vmem:[%s1612_s2 + $0x218] sm:$0xff] %v706_v3 }
  0x46   :  { %709 = vst [vmem:[%s1612_s2 + $0x220] sm:$0xff] %v708_v4 }
  0x47   :  { %711 = vst [vmem:[%s1612_s2 + $0x228] sm:$0xff] %v710_v5 }
  0x48   :  { %713 = vst [vmem:[%s1612_s2 + $0x230] sm:$0xff] %v712_v6 }
  0x49   :  { %715 = vst [vmem:[%s1612_s2 + $0x238] sm:$0xff] %v714_v7 }
  0x4a   :  { %717 = vst [vmem:[%s1612_s2 + $0x240] sm:$0xff] %v716_v8 }
  0x4b   :  { %719 = vst [vmem:[%s1612_s2 + $0x248] sm:$0xff] %v718_v9 }
  0x4c   :  { %721 = vst [vmem:[%s1612_s2 + $0x250] sm:$0xff] %v720_v10 }
  0x4d   :  { %723 = vst [vmem:[%s1612_s2 + $0x258] sm:$0xff] %v722_v11 }
  0x4e   :  { %725 = vst [vmem:[%s1612_s2 + $0x260] sm:$0xff] %v724_v12 }
  0x4f   :  { %727 = vst [vmem:[%s1612_s2 + $0x268] sm:$0xff] %v726_v13 }
  0x50   :  { %729 = vst [vmem:[%s1612_s2 + $0x270] sm:$0xff] %v728_v14 }
  0x51   :  { %731 = vst [vmem:[%s1612_s2 + $0x278] sm:$0xff] %v730_v15 }
  0x52   :  { %733 = vst [vmem:[%s1612_s2 + $0x280] sm:$0xff] %v732_v16 }
  0x53   :  { %735 = vst [vmem:[%s1612_s2 + $0x288] sm:$0xff] %v734_v17 }
  0x54   :  { %737 = vst [vmem:[%s1612_s2 + $0x290] sm:$0xff] %v736_v18 }
  0x55   :  { %739 = vst [vmem:[%s1612_s2 + $0x298] sm:$0xff] %v738_v19 }
  0x56   :  { %741 = vst [vmem:[%s1612_s2 + $0x2a0] sm:$0xff] %v740_v20 }
  0x57   :  { %743 = vst [vmem:[%s1612_s2 + $0x2a8] sm:$0xff] %v742_v21 }
  0x58   :  { %745 = vst [vmem:[%s1612_s2 + $0x2b0] sm:$0xff] %v744_v22 }
  0x59   :  { %747 = vst [vmem:[%s1612_s2 + $0x2b8] sm:$0xff] %v746_v23 }
  0x5a   :  { %749 = vst [vmem:[%s1612_s2 + $0x2c0] sm:$0xff] %v748_v24 }
  0x5b   :  { %751 = vst [vmem:[%s1612_s2 + $0x2c8] sm:$0xff] %v750_v25 }
  0x5c   :  { %753 = vst [vmem:[%s1612_s2 + $0x2d0] sm:$0xff] %v752_v26 }
  0x5d   :  { %755 = vst [vmem:[%s1612_s2 + $0x2d8] sm:$0xff] %v754_v27 }
  0x5e   :  { %757 = vst [vmem:[%s1612_s2 + $0x2e0] sm:$0xff] %v756_v28 }
  0x5f   :  { %759 = vst [vmem:[%s1612_s2 + $0x2e8] sm:$0xff] %v758_v29 }
  0x60   :  { %761 = vst [vmem:[%s1612_s2 + $0x2f0] sm:$0xff] %v760_v30 }
  0x61   :  { %763 = vst [vmem:[%s1612_s2 + $0x2f8] sm:$0xff] %v762_v31 }
  0x62   :  { %765 = vst [vmem:[%s1612_s2 + $0x300] sm:$0xff] %v764_v32 }
  0x63   :  { %767 = vst [vmem:[%s1612_s2 + $0x308] sm:$0xff] %v766_v33 }
  0x64   :  { %769 = vst [vmem:[%s1612_s2 + $0x310] sm:$0xff] %v768_v34 }
  0x65   :  { %771 = vst [vmem:[%s1612_s2 + $0x318] sm:$0xff] %v770_v35 }
  0x66   :  { %773 = vst [vmem:[%s1612_s2 + $0x320] sm:$0xff] %v772_v36 }
  0x67   :  { %775 = vst [vmem:[%s1612_s2 + $0x328] sm:$0xff] %v774_v37 }
  0x68   :  { %777 = vst [vmem:[%s1612_s2 + $0x330] sm:$0xff] %v776_v38 }
  0x69   :  { %779 = vst [vmem:[%s1612_s2 + $0x338] sm:$0xff] %v778_v39 }
  0x6a   :  { %781 = vst [vmem:[%s1612_s2 + $0x340] sm:$0xff] %v780_v40 }
  0x6b   :  { %783 = vst [vmem:[%s1612_s2 + $0x348] sm:$0xff] %v782_v41 }
  0x6c   :  { %785 = vst [vmem:[%s1612_s2 + $0x350] sm:$0xff] %v784_v42 }
  0x6d   :  { %787 = vst [vmem:[%s1612_s2 + $0x358] sm:$0xff] %v786_v43 }
  0x6e   :  { %789 = vst [vmem:[%s1612_s2 + $0x360] sm:$0xff] %v788_v44 }
  0x6f   :  { %791 = vst [vmem:[%s1612_s2 + $0x368] sm:$0xff] %v790_v45 }
  0x70   :  { %793 = vst [vmem:[%s1612_s2 + $0x370] sm:$0xff] %v792_v46 }
  0x71   :  { %795 = vst [vmem:[%s1612_s2 + $0x378] sm:$0xff] %v794_v47 }
  0x72   :  { %797 = vst [vmem:[%s1612_s2 + $0x380] sm:$0xff] %v796_v48 }
  0x73   :  { %799 = vst [vmem:[%s1612_s2 + $0x388] sm:$0xff] %v798_v49 }
  0x74   :  { %801 = vst [vmem:[%s1612_s2 + $0x390] sm:$0xff] %v800_v50 }
  0x75   :  { %803 = vst [vmem:[%s1612_s2 + $0x398] sm:$0xff] %v802_v51 }
  0x76   :  { %805 = vst [vmem:[%s1612_s2 + $0x3a0] sm:$0xff] %v804_v52 }
  0x77   :  { %807 = vst [vmem:[%s1612_s2 + $0x3a8] sm:$0xff] %v806_v53 }
  0x78   :  { %809 = vst [vmem:[%s1612_s2 + $0x3b0] sm:$0xff] %v808_v54 }
  0x79   :  { %811 = vst [vmem:[%s1612_s2 + $0x3b8] sm:$0xff] %v810_v55 }
  0x7a   :  { %813 = vst [vmem:[%s1612_s2 + $0x3c0] sm:$0xff] %v812_v56 }
  0x7b   :  { %815 = vst [vmem:[%s1612_s2 + $0x3c8] sm:$0xff] %v814_v57 }
  0x7c   :  { %817 = vst [vmem:[%s1612_s2 + $0x3d0] sm:$0xff] %v816_v58 }
  0x7d   :  { %819 = vst [vmem:[%s1612_s2 + $0x3d8] sm:$0xff] %v818_v59 }
  0x7e   :  { %821 = vst [vmem:[%s1612_s2 + $0x3e0] sm:$0xff] %v820_v60 }
  0x7f   :  { %823 = vst [vmem:[%s1612_s2 + $0x3e8] sm:$0xff] %v822_v61 }
  0x80   :  { %825 = vst [vmem:[%s1612_s2 + $0x3f0] sm:$0xff] %v824_v62 }
  0x81   :  { %827 = vst [vmem:[%s1612_s2 + $0x3f8] sm:$0xff] %v826_v63 }

</bundles_post_ra>
